<compile_context>
chip_gen: v7x
topology: tpu7x:2x2x1
jax: 0.10.0
libtpu: 0.0.40
codegen_flags: <defaults>
</compile_context>

<pallas_src>
import functools

import numpy as np
import jax
import jax.numpy as jnp
from jax.experimental import pallas as pl
from jax.experimental.pallas import tpu as pltpu

EPS = 1e-5
MXU_DTYPE = jnp.bfloat16   # matmul operands only; accumulation + all elementwise math stay f32


def _resblocks_kernel(num_blocks, H, W, C, x_ref, w_ref, o_ref, xpad_ref):
    """Fused ResBlocks chain for one batch tile.

    x_ref    : (Bt, H, W*C)  f32  lane-dense activations (lane index = w*C + c)
    w_ref    : (2*num_blocks, 3, W*C, W*C) bf16 banded conv weights (one slice per dy)
    o_ref    : (Bt, H, W*C)
    xpad_ref : VMEM scratch (Bt, H+2, W*C) f32 -- H-padded activations; rows 0 and H+1
               are the zero padding and are never written by the interior store.
    """
    Bt = x_ref.shape[0]
    WC = W * C
    inv_hw = 1.0 / (H * W)

    # Re-zero only the two padding rows, every grid step (tiny full-lane stores).
    # Megacore-safe: no reliance on program_id==0 having initialized this core's scratch.
    zrow = jnp.zeros((Bt, 1, WC), xpad_ref.dtype)
    xpad_ref[:, 0:1, :] = zrow
    xpad_ref[:, H + 1:H + 2, :] = zrow

    def channel_sums(rows):
        # rows: (Bt, WC) f32 = per-image, per-lane sums over H.
        # Returns (Bt, WC) where every lane holds its channel's full spatial sum
        # (already broadcast to all W lane-groups).  log2(W) roll+add tree (XLU slot).
        out = rows
        shift = C
        while shift < WC:                      # requires W to be a power of two
            out = out + pltpu.roll(out, shift=shift, axis=1)
            shift *= 2
        return out

    def conv_in_block(act, w_idx, relu):
        # act: (Bt, H, WC) f32.  Conv3x3(pad=1) + InstanceNorm2d(no affine) [+ ReLU].
        xpad_ref[:, 1:H + 1, :] = act
        xp = xpad_ref[...].astype(MXU_DTYPE)   # one cast per conv; value slicing below

        acc = jnp.zeros((Bt * H, WC), jnp.float32)
        for dy in range(3):                    # 3 accumulated MXU dots, K = W*C
            lhs = xp[:, dy:dy + H, :].reshape(Bt * H, WC)   # leading-dim merge: free
            acc = acc + jnp.dot(lhs, w_ref[w_idx, dy],
                                preferred_element_type=jnp.float32)
        acc = acc.reshape(Bt, H, WC)

        # InstanceNorm2d: per-image, per-channel stats over H*W.  Two-pass (centered)
        # variance for numerical robustness.  Conv bias omitted on purpose -- exactly
        # cancelled by this per-channel mean subtraction (affine-free IN).
        mean = channel_sums(jnp.sum(acc, axis=1)) * inv_hw            # (Bt, WC)
        centered = acc - mean[:, None, :]
        var = channel_sums(jnp.sum(centered * centered, axis=1)) * inv_hw
        y = centered * jax.lax.rsqrt(var + EPS)[:, None, :]
        if relu:
            y = jnp.maximum(y, 0.0)
        return y

    x = x_ref[...].astype(jnp.float32)
    for blk in range(num_blocks):
        h = conv_in_block(x, 2 * blk, relu=True)          # conv + IN + ReLU
        y = conv_in_block(h, 2 * blk + 1, relu=False)     # conv + IN
        x = x + y                                         # residual
    o_ref[...] = x.astype(o_ref.dtype)                    # lane-dense store


def resblocks_forward(x_nchw, w_banded, num_blocks, batch_tile=None):
    """ResBlocks.forward.  x_nchw: (B, C, H, W) like PyTorch; returns (B, C, H, W)."""
    B, C, H, W = x_nchw.shape
    WC = W * C
    assert w_banded.shape == (2 * num_blocks, 3, WC, WC), w_banded.shape
    assert W & (W - 1) == 0, "lane roll-reduce assumes W is a power of two"
    # TODO(synk): non-power-of-two W needs a (W-1)-step roll reduction (or a sum matrix).

    if batch_tile is None:                     # largest divisor of B that is <= 8
        batch_tile = max(d for d in range(1, min(B, 8) + 1) if B % d == 0)
    bt = batch_tile
    assert B % bt == 0, (B, bt)

    # NCHW -> NHWC -> fold (W, C) into one lane-dense trailing dim (layout plumbing in HBM).
    x = jnp.transpose(x_nchw, (0, 2, 3, 1)).reshape(B, H, WC)

    kernel = functools.partial(_resblocks_kernel, num_blocks, H, W, C)

    flops = 2 * B * (2 * num_blocks) * 3 * H * WC * WC            # banded-matmul MACs * 2
    bytes_accessed = (2 * x.size * x.dtype.itemsize               # read x + write out
                      + w_banded.size * w_banded.dtype.itemsize)  # weights (resident)
    cost = pl.CostEstimate(flops=flops,
                           transcendentals=B * (2 * num_blocks) * WC,
                           bytes_accessed=bytes_accessed)

    out = pl.pallas_call(
        kernel,
        out_shape=jax.ShapeDtypeStruct((B, H, WC), x_nchw.dtype),
        grid=(B // bt,),
        in_specs=[
            pl.BlockSpec((bt, H, WC), lambda i: (i, 0, 0)),
            # whole weight stack, same block for every step -> fetched once, stays resident
            pl.BlockSpec((2 * num_blocks, 3, WC, WC), lambda i: (0, 0, 0, 0)),
        ],
        out_specs=pl.BlockSpec((bt, H, WC), lambda i: (i, 0, 0)),
        scratch_shapes=[pltpu.VMEM((bt, H + 2, WC), jnp.float32)],
        compiler_params=pltpu.CompilerParams(
            dimension_semantics=("parallel",),
            # Ample for these shapes on all chips; raise on v5e/v6e (128 MiB physical) or
            # switch to the H-tiled two-pass-IN variant on v7x (64 MiB) at production sizes.
            vmem_limit_bytes=32 * 1024 * 1024,
        ),
        cost_estimate=cost,
    )(x, w_banded)

    return jnp.transpose(out.reshape(B, H, W, C), (0, 3, 1, 2))


def prep_params(params_pt, W):
    """PyTorch (OIHW weight, bias) per block -> banded bf16 weights for the kernel.

    Returns (2*num_blocks, 3, W*C, W*C): slice [conv, dy] maps input lane w_in*C + cin
    to output lane w_out*C + cout with value weight[cout, cin, dy, dx] where
    w_in = w_out + dx - 1; out-of-range w_in entries are simply absent, which
    implements the W zero-padding inside the matmul.  Biases are dropped on purpose:
    the affine-free InstanceNorm subtracts the per-channel mean, cancelling them exactly.
    """
    mats = []
    for (w1, _b1, w2, _b2) in params_pt:
        for wconv in (w1, w2):
            wnp = np.asarray(wconv)                     # (Cout, Cin, 3, 3)
            C_out, C_in = wnp.shape[0], wnp.shape[1]
            assert C_out == C_in
            C = C_in
            per_dy = []
            for dy in range(3):
                band = np.zeros((W * C, W * C), np.float32)
                for dx in range(3):
                    blk = wnp[:, :, dy, dx].T           # (cin, cout)
                    for w_out in range(W):
                        w_in = w_out + dx - 1
                        if 0 <= w_in < W:
                            band[w_in * C:(w_in + 1) * C,
                                 w_out * C:(w_out + 1) * C] = blk
                per_dy.append(band)
            mats.append(np.stack(per_dy))
    return jnp.asarray(np.stack(mats), dtype=MXU_DTYPE)


# ---------------- pure-JAX reference (for correctness check only) ----------------

def _ref_conv(x, w, b):  # x NCHW, w OIHW
    y = jax.lax.conv_general_dilated(
        x, w, window_strides=(1, 1), padding=((1, 1), (1, 1)),
        dimension_numbers=("NCHW", "OIHW", "NCHW"))
    return y + b[None, :, None, None]


def _ref_instnorm(x):
    mean = jnp.mean(x, axis=(2, 3), keepdims=True)
    var = jnp.mean((x - mean) ** 2, axis=(2, 3), keepdims=True)
    return (x - mean) * jax.lax.rsqrt(var + EPS)


def ref_forward(x, params_pt):
    for (w1, b1, w2, b2) in params_pt:
        h = jnp.maximum(_ref_instnorm(_ref_conv(x, w1, b1)), 0.0)
        h = _ref_instnorm(_ref_conv(h, w2, b2))
        x = h + x
    return x


# ----------------------------------------------------------------------------------

if __name__ == "__main__":
    B, C, H, W = 2, 8, 16, 16      # W*C = 128 -> lane-dense layout throughout
    num_blocks = 2

    key = jax.random.PRNGKey(0)
    keys = jax.random.split(key, 1 + 4 * num_blocks)
    x = jax.random.normal(keys[0], (B, C, H, W), jnp.float32)

    # deterministic parameters (PyTorch conv layout: OIHW weight, (C,) bias)
    params_pt = []
    for i in range(num_blocks):
        w1 = 0.1 * jax.random.normal(keys[1 + 4 * i], (C, C, 3, 3), jnp.float32)
        b1 = 0.1 * jax.random.normal(keys[2 + 4 * i], (C,), jnp.float32)
        w2 = 0.1 * jax.random.normal(keys[3 + 4 * i], (C, C, 3, 3), jnp.float32)
        b2 = 0.1 * jax.random.normal(keys[4 + 4 * i], (C,), jnp.float32)
        params_pt.append((w1, b1, w2, b2))

    w_banded = prep_params(params_pt, W)

    out = resblocks_forward(x, w_banded, num_blocks)
    out = jax.block_until_ready(out)

    ref = ref_forward(x, params_pt)
    assert out.shape == (B, C, H, W), out.shape
    err = jnp.abs(out - ref)
    max_err = float(jnp.max(err))
    mean_err = float(jnp.mean(err))
    # MXU operands are bf16 (f32 accumulation); IN/ReLU/residual math is f32.
    assert max_err < 1e-1, f"max abs error {max_err}"
    assert mean_err < 2e-2, f"mean abs error {mean_err}"

    print("KERNEL_OK")
</pallas_src>

<mosaic_0001>
module attributes {stable_mosaic.version = 11 : i64} {
  func.func @_resblocks_kernel(%arg0: i32, %arg1: memref<2x16x128xf32, #tpu.memory_space<vmem>>, %arg2: memref<4x3x128x128xbf16, #tpu.memory_space<vmem>>, %arg3: memref<2x16x128xf32, #tpu.memory_space<vmem>>, %arg4: memref<2x18x128xf32, #tpu.memory_space<vmem>>) attributes {dimension_semantics = [#tpu.dimension_semantics<parallel>], iteration_bounds = array<i64: 1>, scalar_prefetch = 0 : i64, scratch_operands = 1 : i64, tpu.core_type = #tpu.core_type<tc>, window_params = [{transform_indices = @transform_0, window_bounds = array<i64: 2, 16, 128>}, {pipeline_mode = #tpu.pipeline_mode<synchronous>, transform_indices = @transform_1, window_bounds = array<i64: 4, 3, 128, 128>}, {transform_indices = @transform_2, window_bounds = array<i64: 2, 16, 128>}]} {
    %cst = arith.constant 0.000000e+00 : f32
    %0 = vector.broadcast %cst : f32 to vector<2x1x128xf32>
    %c0 = arith.constant 0 : index
    %c0_0 = arith.constant 0 : index
    %c0_1 = arith.constant 0 : index
    %1 = vector.load %arg4[%c0, %c0_0, %c0_1] : memref<2x18x128xf32, #tpu.memory_space<vmem>>, vector<2x1x128xf32>
    tpu.vector_store %arg4[%c0, %c0_0, %c0_1], %0 {strides = array<i32>} : memref<2x18x128xf32, #tpu.memory_space<vmem>>, vector<2x1x128xf32>,
    %c0_2 = arith.constant 0 : index
    %c17 = arith.constant 17 : index
    %c0_3 = arith.constant 0 : index
    %2 = vector.load %arg4[%c0_2, %c17, %c0_3] : memref<2x18x128xf32, #tpu.memory_space<vmem>>, vector<2x1x128xf32>
    tpu.vector_store %arg4[%c0_2, %c17, %c0_3], %0 {strides = array<i32>} : memref<2x18x128xf32, #tpu.memory_space<vmem>>, vector<2x1x128xf32>,
    %c0_4 = arith.constant 0 : index
    %c0_5 = arith.constant 0 : index
    %c0_6 = arith.constant 0 : index
    %3 = vector.load %arg1[%c0_4, %c0_5, %c0_6] : memref<2x16x128xf32, #tpu.memory_space<vmem>>, vector<2x16x128xf32>
    %c0_7 = arith.constant 0 : index
    %c1 = arith.constant 1 : index
    %c0_8 = arith.constant 0 : index
    %4 = vector.load %arg4[%c0_7, %c1, %c0_8] : memref<2x18x128xf32, #tpu.memory_space<vmem>>, vector<2x16x128xf32>
    tpu.vector_store %arg4[%c0_7, %c1, %c0_8], %3 {strides = array<i32>} : memref<2x18x128xf32, #tpu.memory_space<vmem>>, vector<2x16x128xf32>,
    %c0_9 = arith.constant 0 : index
    %c0_10 = arith.constant 0 : index
    %c0_11 = arith.constant 0 : index
    %5 = vector.load %arg4[%c0_9, %c0_10, %c0_11] : memref<2x18x128xf32, #tpu.memory_space<vmem>>, vector<2x18x128xf32>
    %6 = arith.truncf %5 : vector<2x18x128xf32> to vector<2x18x128xbf16>
    %cst_12 = arith.constant 0.000000e+00 : f32
    %7 = vector.broadcast %cst_12 : f32 to vector<32x128xf32>
    %8 = vector.extract_strided_slice %6 {offsets = [0, 0, 0], sizes = [2, 16, 128], strides = [1, 1, 1]} : vector<2x18x128xbf16> to vector<2x16x128xbf16>
    %9 = vector.shape_cast %8 : vector<2x16x128xbf16> to vector<32x128xbf16>
    %c0_13 = arith.constant 0 : index
    %c0_14 = arith.constant 0 : index
    %c0_15 = arith.constant 0 : index
    %c0_16 = arith.constant 0 : index
    %10 = vector.load %arg2[%c0_13, %c0_14, %c0_15, %c0_16] : memref<4x3x128x128xbf16, #tpu.memory_space<vmem>>, vector<1x1x128x128xbf16>
    %11 = vector.shape_cast %10 : vector<1x1x128x128xbf16> to vector<128x128xbf16>
    %cst_17 = arith.constant dense<0.000000e+00> : vector<32x128xf32>
    %12 = tpu.matmul %9, %11, %cst_17 {dimension_numbers = #tpu.dot_dimension_numbers<[1], [0], [0], [1], [0, 0, 1, 1], [], []>} : vector<32x128xbf16>, vector<128x128xbf16>, vector<32x128xf32> -> vector<32x128xf32>
    %13 = arith.addf %7, %12 : vector<32x128xf32>
    %14 = vector.extract_strided_slice %6 {offsets = [0, 1, 0], sizes = [2, 16, 128], strides = [1, 1, 1]} : vector<2x18x128xbf16> to vector<2x16x128xbf16>
    %15 = vector.shape_cast %14 : vector<2x16x128xbf16> to vector<32x128xbf16>
    %c0_18 = arith.constant 0 : index
    %c1_19 = arith.constant 1 : index
    %c0_20 = arith.constant 0 : index
    %c0_21 = arith.constant 0 : index
    %16 = vector.load %arg2[%c0_18, %c1_19, %c0_20, %c0_21] : memref<4x3x128x128xbf16, #tpu.memory_space<vmem>>, vector<1x1x128x128xbf16>
    %17 = vector.shape_cast %16 : vector<1x1x128x128xbf16> to vector<128x128xbf16>
    %cst_22 = arith.constant dense<0.000000e+00> : vector<32x128xf32>
    %18 = tpu.matmul %15, %17, %cst_22 {dimension_numbers = #tpu.dot_dimension_numbers<[1], [0], [0], [1], [0, 0, 1, 1], [], []>} : vector<32x128xbf16>, vector<128x128xbf16>, vector<32x128xf32> -> vector<32x128xf32>
    %19 = arith.addf %13, %18 : vector<32x128xf32>
    %20 = vector.extract_strided_slice %6 {offsets = [0, 2, 0], sizes = [2, 16, 128], strides = [1, 1, 1]} : vector<2x18x128xbf16> to vector<2x16x128xbf16>
    %21 = vector.shape_cast %20 : vector<2x16x128xbf16> to vector<32x128xbf16>
    %c0_23 = arith.constant 0 : index
    %c2 = arith.constant 2 : index
    %c0_24 = arith.constant 0 : index
    %c0_25 = arith.constant 0 : index
    %22 = vector.load %arg2[%c0_23, %c2, %c0_24, %c0_25] : memref<4x3x128x128xbf16, #tpu.memory_space<vmem>>, vector<1x1x128x128xbf16>
    %23 = vector.shape_cast %22 : vector<1x1x128x128xbf16> to vector<128x128xbf16>
    %cst_26 = arith.constant dense<0.000000e+00> : vector<32x128xf32>
    %24 = tpu.matmul %21, %23, %cst_26 {dimension_numbers = #tpu.dot_dimension_numbers<[1], [0], [0], [1], [0, 0, 1, 1], [], []>} : vector<32x128xbf16>, vector<128x128xbf16>, vector<32x128xf32> -> vector<32x128xf32>
    %25 = arith.addf %19, %24 : vector<32x128xf32>
    %26 = vector.shape_cast %25 : vector<32x128xf32> to vector<2x16x128xf32>
    %cst_27 = arith.constant dense<0.000000e+00> : vector<2x128xf32>
    %27 = vector.multi_reduction <add>, %26, %cst_27 [1] : vector<2x16x128xf32> to vector<2x128xf32>
    %c8_i32 = arith.constant 8 : i32
    %28 = tpu.dynamic_rotate %27 by %c8_i32 dim 1 : vector<2x128xf32>, i32 -> vector<2x128xf32>
    %29 = arith.addf %27, %28 : vector<2x128xf32>
    %c16_i32 = arith.constant 16 : i32
    %30 = tpu.dynamic_rotate %29 by %c16_i32 dim 1 : vector<2x128xf32>, i32 -> vector<2x128xf32>
    %31 = arith.addf %29, %30 : vector<2x128xf32>
    %c32_i32 = arith.constant 32 : i32
    %32 = tpu.dynamic_rotate %31 by %c32_i32 dim 1 : vector<2x128xf32>, i32 -> vector<2x128xf32>
    %33 = arith.addf %31, %32 : vector<2x128xf32>
    %c64_i32 = arith.constant 64 : i32
    %34 = tpu.dynamic_rotate %33 by %c64_i32 dim 1 : vector<2x128xf32>, i32 -> vector<2x128xf32>
    %35 = arith.addf %33, %34 : vector<2x128xf32>
    %cst_28 = arith.constant 3.906250e-03 : f32
    %36 = vector.broadcast %cst_28 : f32 to vector<2x128xf32>
    %37 = arith.mulf %35, %36 : vector<2x128xf32>
    %38 = vector.shape_cast %37 : vector<2x128xf32> to vector<2x1x128xf32>
    %39 = vector.broadcast %38 : vector<2x1x128xf32> to vector<2x16x128xf32>
    %40 = arith.subf %26, %39 : vector<2x16x128xf32>
    %41 = arith.mulf %40, %40 : vector<2x16x128xf32>
    %cst_29 = arith.constant dense<0.000000e+00> : vector<2x128xf32>
    %42 = vector.multi_reduction <add>, %41, %cst_29 [1] : vector<2x16x128xf32> to vector<2x128xf32>
    %c8_i32_30 = arith.constant 8 : i32
    %43 = tpu.dynamic_rotate %42 by %c8_i32_30 dim 1 : vector<2x128xf32>, i32 -> vector<2x128xf32>
    %44 = arith.addf %42, %43 : vector<2x128xf32>
    %c16_i32_31 = arith.constant 16 : i32
    %45 = tpu.dynamic_rotate %44 by %c16_i32_31 dim 1 : vector<2x128xf32>, i32 -> vector<2x128xf32>
    %46 = arith.addf %44, %45 : vector<2x128xf32>
    %c32_i32_32 = arith.constant 32 : i32
    %47 = tpu.dynamic_rotate %46 by %c32_i32_32 dim 1 : vector<2x128xf32>, i32 -> vector<2x128xf32>
    %48 = arith.addf %46, %47 : vector<2x128xf32>
    %c64_i32_33 = arith.constant 64 : i32
    %49 = tpu.dynamic_rotate %48 by %c64_i32_33 dim 1 : vector<2x128xf32>, i32 -> vector<2x128xf32>
    %50 = arith.addf %48, %49 : vector<2x128xf32>
    %cst_34 = arith.constant 3.906250e-03 : f32
    %51 = vector.broadcast %cst_34 : f32 to vector<2x128xf32>
    %52 = arith.mulf %50, %51 : vector<2x128xf32>
    %cst_35 = arith.constant 9.99999974E-6 : f32
    %53 = vector.broadcast %cst_35 : f32 to vector<2x128xf32>
    %54 = arith.addf %52, %53 : vector<2x128xf32>
    %55 = math.rsqrt %54 : vector<2x128xf32>
    %56 = vector.shape_cast %55 : vector<2x128xf32> to vector<2x1x128xf32>
    %57 = vector.broadcast %56 : vector<2x1x128xf32> to vector<2x16x128xf32>
    %58 = arith.mulf %40, %57 : vector<2x16x128xf32>
    %cst_36 = arith.constant 0.000000e+00 : f32
    %59 = vector.broadcast %cst_36 : f32 to vector<2x16x128xf32>
    %60 = arith.maximumf %58, %59 : vector<2x16x128xf32>
    %c0_37 = arith.constant 0 : index
    %c1_38 = arith.constant 1 : index
    %c0_39 = arith.constant 0 : index
    %61 = vector.load %arg4[%c0_37, %c1_38, %c0_39] : memref<2x18x128xf32, #tpu.memory_space<vmem>>, vector<2x16x128xf32>
    tpu.vector_store %arg4[%c0_37, %c1_38, %c0_39], %60 {strides = array<i32>} : memref<2x18x128xf32, #tpu.memory_space<vmem>>, vector<2x16x128xf32>,
    %c0_40 = arith.constant 0 : index
    %c0_41 = arith.constant 0 : index
    %c0_42 = arith.constant 0 : index
    %62 = vector.load %arg4[%c0_40, %c0_41, %c0_42] : memref<2x18x128xf32, #tpu.memory_space<vmem>>, vector<2x18x128xf32>
    %63 = arith.truncf %62 : vector<2x18x128xf32> to vector<2x18x128xbf16>
    %cst_43 = arith.constant 0.000000e+00 : f32
    %64 = vector.broadcast %cst_43 : f32 to vector<32x128xf32>
    %65 = vector.extract_strided_slice %63 {offsets = [0, 0, 0], sizes = [2, 16, 128], strides = [1, 1, 1]} : vector<2x18x128xbf16> to vector<2x16x128xbf16>
    %66 = vector.shape_cast %65 : vector<2x16x128xbf16> to vector<32x128xbf16>
    %c1_44 = arith.constant 1 : index
    %c0_45 = arith.constant 0 : index
    %c0_46 = arith.constant 0 : index
    %c0_47 = arith.constant 0 : index
    %67 = vector.load %arg2[%c1_44, %c0_45, %c0_46, %c0_47] : memref<4x3x128x128xbf16, #tpu.memory_space<vmem>>, vector<1x1x128x128xbf16>
    %68 = vector.shape_cast %67 : vector<1x1x128x128xbf16> to vector<128x128xbf16>
    %cst_48 = arith.constant dense<0.000000e+00> : vector<32x128xf32>
    %69 = tpu.matmul %66, %68, %cst_48 {dimension_numbers = #tpu.dot_dimension_numbers<[1], [0], [0], [1], [0, 0, 1, 1], [], []>} : vector<32x128xbf16>, vector<128x128xbf16>, vector<32x128xf32> -> vector<32x128xf32>
    %70 = arith.addf %64, %69 : vector<32x128xf32>
    %71 = vector.extract_strided_slice %63 {offsets = [0, 1, 0], sizes = [2, 16, 128], strides = [1, 1, 1]} : vector<2x18x128xbf16> to vector<2x16x128xbf16>
    %72 = vector.shape_cast %71 : vector<2x16x128xbf16> to vector<32x128xbf16>
    %c1_49 = arith.constant 1 : index
    %c1_50 = arith.constant 1 : index
    %c0_51 = arith.constant 0 : index
    %c0_52 = arith.constant 0 : index
    %73 = vector.load %arg2[%c1_49, %c1_50, %c0_51, %c0_52] : memref<4x3x128x128xbf16, #tpu.memory_space<vmem>>, vector<1x1x128x128xbf16>
    %74 = vector.shape_cast %73 : vector<1x1x128x128xbf16> to vector<128x128xbf16>
    %cst_53 = arith.constant dense<0.000000e+00> : vector<32x128xf32>
    %75 = tpu.matmul %72, %74, %cst_53 {dimension_numbers = #tpu.dot_dimension_numbers<[1], [0], [0], [1], [0, 0, 1, 1], [], []>} : vector<32x128xbf16>, vector<128x128xbf16>, vector<32x128xf32> -> vector<32x128xf32>
    %76 = arith.addf %70, %75 : vector<32x128xf32>
    %77 = vector.extract_strided_slice %63 {offsets = [0, 2, 0], sizes = [2, 16, 128], strides = [1, 1, 1]} : vector<2x18x128xbf16> to vector<2x16x128xbf16>
    %78 = vector.shape_cast %77 : vector<2x16x128xbf16> to vector<32x128xbf16>
    %c1_54 = arith.constant 1 : index
    %c2_55 = arith.constant 2 : index
    %c0_56 = arith.constant 0 : index
    %c0_57 = arith.constant 0 : index
    %79 = vector.load %arg2[%c1_54, %c2_55, %c0_56, %c0_57] : memref<4x3x128x128xbf16, #tpu.memory_space<vmem>>, vector<1x1x128x128xbf16>
    %80 = vector.shape_cast %79 : vector<1x1x128x128xbf16> to vector<128x128xbf16>
    %cst_58 = arith.constant dense<0.000000e+00> : vector<32x128xf32>
    %81 = tpu.matmul %78, %80, %cst_58 {dimension_numbers = #tpu.dot_dimension_numbers<[1], [0], [0], [1], [0, 0, 1, 1], [], []>} : vector<32x128xbf16>, vector<128x128xbf16>, vector<32x128xf32> -> vector<32x128xf32>
    %82 = arith.addf %76, %81 : vector<32x128xf32>
    %83 = vector.shape_cast %82 : vector<32x128xf32> to vector<2x16x128xf32>
    %cst_59 = arith.constant dense<0.000000e+00> : vector<2x128xf32>
    %84 = vector.multi_reduction <add>, %83, %cst_59 [1] : vector<2x16x128xf32> to vector<2x128xf32>
    %c8_i32_60 = arith.constant 8 : i32
    %85 = tpu.dynamic_rotate %84 by %c8_i32_60 dim 1 : vector<2x128xf32>, i32 -> vector<2x128xf32>
    %86 = arith.addf %84, %85 : vector<2x128xf32>
    %c16_i32_61 = arith.constant 16 : i32
    %87 = tpu.dynamic_rotate %86 by %c16_i32_61 dim 1 : vector<2x128xf32>, i32 -> vector<2x128xf32>
    %88 = arith.addf %86, %87 : vector<2x128xf32>
    %c32_i32_62 = arith.constant 32 : i32
    %89 = tpu.dynamic_rotate %88 by %c32_i32_62 dim 1 : vector<2x128xf32>, i32 -> vector<2x128xf32>
    %90 = arith.addf %88, %89 : vector<2x128xf32>
    %c64_i32_63 = arith.constant 64 : i32
    %91 = tpu.dynamic_rotate %90 by %c64_i32_63 dim 1 : vector<2x128xf32>, i32 -> vector<2x128xf32>
    %92 = arith.addf %90, %91 : vector<2x128xf32>
    %cst_64 = arith.constant 3.906250e-03 : f32
    %93 = vector.broadcast %cst_64 : f32 to vector<2x128xf32>
    %94 = arith.mulf %92, %93 : vector<2x128xf32>
    %95 = vector.shape_cast %94 : vector<2x128xf32> to vector<2x1x128xf32>
    %96 = vector.broadcast %95 : vector<2x1x128xf32> to vector<2x16x128xf32>
    %97 = arith.subf %83, %96 : vector<2x16x128xf32>
    %98 = arith.mulf %97, %97 : vector<2x16x128xf32>
    %cst_65 = arith.constant dense<0.000000e+00> : vector<2x128xf32>
    %99 = vector.multi_reduction <add>, %98, %cst_65 [1] : vector<2x16x128xf32> to vector<2x128xf32>
    %c8_i32_66 = arith.constant 8 : i32
    %100 = tpu.dynamic_rotate %99 by %c8_i32_66 dim 1 : vector<2x128xf32>, i32 -> vector<2x128xf32>
    %101 = arith.addf %99, %100 : vector<2x128xf32>
    %c16_i32_67 = arith.constant 16 : i32
    %102 = tpu.dynamic_rotate %101 by %c16_i32_67 dim 1 : vector<2x128xf32>, i32 -> vector<2x128xf32>
    %103 = arith.addf %101, %102 : vector<2x128xf32>
    %c32_i32_68 = arith.constant 32 : i32
    %104 = tpu.dynamic_rotate %103 by %c32_i32_68 dim 1 : vector<2x128xf32>, i32 -> vector<2x128xf32>
    %105 = arith.addf %103, %104 : vector<2x128xf32>
    %c64_i32_69 = arith.constant 64 : i32
    %106 = tpu.dynamic_rotate %105 by %c64_i32_69 dim 1 : vector<2x128xf32>, i32 -> vector<2x128xf32>
    %107 = arith.addf %105, %106 : vector<2x128xf32>
    %cst_70 = arith.constant 3.906250e-03 : f32
    %108 = vector.broadcast %cst_70 : f32 to vector<2x128xf32>
    %109 = arith.mulf %107, %108 : vector<2x128xf32>
    %cst_71 = arith.constant 9.99999974E-6 : f32
    %110 = vector.broadcast %cst_71 : f32 to vector<2x128xf32>
    %111 = arith.addf %109, %110 : vector<2x128xf32>
    %112 = math.rsqrt %111 : vector<2x128xf32>
    %113 = vector.shape_cast %112 : vector<2x128xf32> to vector<2x1x128xf32>
    %114 = vector.broadcast %113 : vector<2x1x128xf32> to vector<2x16x128xf32>
    %115 = arith.mulf %97, %114 : vector<2x16x128xf32>
    %116 = arith.addf %3, %115 : vector<2x16x128xf32>
    %c0_72 = arith.constant 0 : index
    %c1_73 = arith.constant 1 : index
    %c0_74 = arith.constant 0 : index
    %117 = vector.load %arg4[%c0_72, %c1_73, %c0_74] : memref<2x18x128xf32, #tpu.memory_space<vmem>>, vector<2x16x128xf32>
    tpu.vector_store %arg4[%c0_72, %c1_73, %c0_74], %116 {strides = array<i32>} : memref<2x18x128xf32, #tpu.memory_space<vmem>>, vector<2x16x128xf32>,
    %c0_75 = arith.constant 0 : index
    %c0_76 = arith.constant 0 : index
    %c0_77 = arith.constant 0 : index
    %118 = vector.load %arg4[%c0_75, %c0_76, %c0_77] : memref<2x18x128xf32, #tpu.memory_space<vmem>>, vector<2x18x128xf32>
    %119 = arith.truncf %118 : vector<2x18x128xf32> to vector<2x18x128xbf16>
    %cst_78 = arith.constant 0.000000e+00 : f32
    %120 = vector.broadcast %cst_78 : f32 to vector<32x128xf32>
    %121 = vector.extract_strided_slice %119 {offsets = [0, 0, 0], sizes = [2, 16, 128], strides = [1, 1, 1]} : vector<2x18x128xbf16> to vector<2x16x128xbf16>
    %122 = vector.shape_cast %121 : vector<2x16x128xbf16> to vector<32x128xbf16>
    %c2_79 = arith.constant 2 : index
    %c0_80 = arith.constant 0 : index
    %c0_81 = arith.constant 0 : index
    %c0_82 = arith.constant 0 : index
    %123 = vector.load %arg2[%c2_79, %c0_80, %c0_81, %c0_82] : memref<4x3x128x128xbf16, #tpu.memory_space<vmem>>, vector<1x1x128x128xbf16>
    %124 = vector.shape_cast %123 : vector<1x1x128x128xbf16> to vector<128x128xbf16>
    %cst_83 = arith.constant dense<0.000000e+00> : vector<32x128xf32>
    %125 = tpu.matmul %122, %124, %cst_83 {dimension_numbers = #tpu.dot_dimension_numbers<[1], [0], [0], [1], [0, 0, 1, 1], [], []>} : vector<32x128xbf16>, vector<128x128xbf16>, vector<32x128xf32> -> vector<32x128xf32>
    %126 = arith.addf %120, %125 : vector<32x128xf32>
    %127 = vector.extract_strided_slice %119 {offsets = [0, 1, 0], sizes = [2, 16, 128], strides = [1, 1, 1]} : vector<2x18x128xbf16> to vector<2x16x128xbf16>
    %128 = vector.shape_cast %127 : vector<2x16x128xbf16> to vector<32x128xbf16>
    %c2_84 = arith.constant 2 : index
    %c1_85 = arith.constant 1 : index
    %c0_86 = arith.constant 0 : index
    %c0_87 = arith.constant 0 : index
    %129 = vector.load %arg2[%c2_84, %c1_85, %c0_86, %c0_87] : memref<4x3x128x128xbf16, #tpu.memory_space<vmem>>, vector<1x1x128x128xbf16>
    %130 = vector.shape_cast %129 : vector<1x1x128x128xbf16> to vector<128x128xbf16>
    %cst_88 = arith.constant dense<0.000000e+00> : vector<32x128xf32>
    %131 = tpu.matmul %128, %130, %cst_88 {dimension_numbers = #tpu.dot_dimension_numbers<[1], [0], [0], [1], [0, 0, 1, 1], [], []>} : vector<32x128xbf16>, vector<128x128xbf16>, vector<32x128xf32> -> vector<32x128xf32>
    %132 = arith.addf %126, %131 : vector<32x128xf32>
    %133 = vector.extract_strided_slice %119 {offsets = [0, 2, 0], sizes = [2, 16, 128], strides = [1, 1, 1]} : vector<2x18x128xbf16> to vector<2x16x128xbf16>
    %134 = vector.shape_cast %133 : vector<2x16x128xbf16> to vector<32x128xbf16>
    %c2_89 = arith.constant 2 : index
    %c2_90 = arith.constant 2 : index
    %c0_91 = arith.constant 0 : index
    %c0_92 = arith.constant 0 : index
    %135 = vector.load %arg2[%c2_89, %c2_90, %c0_91, %c0_92] : memref<4x3x128x128xbf16, #tpu.memory_space<vmem>>, vector<1x1x128x128xbf16>
    %136 = vector.shape_cast %135 : vector<1x1x128x128xbf16> to vector<128x128xbf16>
    %cst_93 = arith.constant dense<0.000000e+00> : vector<32x128xf32>
    %137 = tpu.matmul %134, %136, %cst_93 {dimension_numbers = #tpu.dot_dimension_numbers<[1], [0], [0], [1], [0, 0, 1, 1], [], []>} : vector<32x128xbf16>, vector<128x128xbf16>, vector<32x128xf32> -> vector<32x128xf32>
    %138 = arith.addf %132, %137 : vector<32x128xf32>
    %139 = vector.shape_cast %138 : vector<32x128xf32> to vector<2x16x128xf32>
    %cst_94 = arith.constant dense<0.000000e+00> : vector<2x128xf32>
    %140 = vector.multi_reduction <add>, %139, %cst_94 [1] : vector<2x16x128xf32> to vector<2x128xf32>
    %c8_i32_95 = arith.constant 8 : i32
    %141 = tpu.dynamic_rotate %140 by %c8_i32_95 dim 1 : vector<2x128xf32>, i32 -> vector<2x128xf32>
    %142 = arith.addf %140, %141 : vector<2x128xf32>
    %c16_i32_96 = arith.constant 16 : i32
    %143 = tpu.dynamic_rotate %142 by %c16_i32_96 dim 1 : vector<2x128xf32>, i32 -> vector<2x128xf32>
    %144 = arith.addf %142, %143 : vector<2x128xf32>
    %c32_i32_97 = arith.constant 32 : i32
    %145 = tpu.dynamic_rotate %144 by %c32_i32_97 dim 1 : vector<2x128xf32>, i32 -> vector<2x128xf32>
    %146 = arith.addf %144, %145 : vector<2x128xf32>
    %c64_i32_98 = arith.constant 64 : i32
    %147 = tpu.dynamic_rotate %146 by %c64_i32_98 dim 1 : vector<2x128xf32>, i32 -> vector<2x128xf32>
    %148 = arith.addf %146, %147 : vector<2x128xf32>
    %cst_99 = arith.constant 3.906250e-03 : f32
    %149 = vector.broadcast %cst_99 : f32 to vector<2x128xf32>
    %150 = arith.mulf %148, %149 : vector<2x128xf32>
    %151 = vector.shape_cast %150 : vector<2x128xf32> to vector<2x1x128xf32>
    %152 = vector.broadcast %151 : vector<2x1x128xf32> to vector<2x16x128xf32>
    %153 = arith.subf %139, %152 : vector<2x16x128xf32>
    %154 = arith.mulf %153, %153 : vector<2x16x128xf32>
    %cst_100 = arith.constant dense<0.000000e+00> : vector<2x128xf32>
    %155 = vector.multi_reduction <add>, %154, %cst_100 [1] : vector<2x16x128xf32> to vector<2x128xf32>
    %c8_i32_101 = arith.constant 8 : i32
    %156 = tpu.dynamic_rotate %155 by %c8_i32_101 dim 1 : vector<2x128xf32>, i32 -> vector<2x128xf32>
    %157 = arith.addf %155, %156 : vector<2x128xf32>
    %c16_i32_102 = arith.constant 16 : i32
    %158 = tpu.dynamic_rotate %157 by %c16_i32_102 dim 1 : vector<2x128xf32>, i32 -> vector<2x128xf32>
    %159 = arith.addf %157, %158 : vector<2x128xf32>
    %c32_i32_103 = arith.constant 32 : i32
    %160 = tpu.dynamic_rotate %159 by %c32_i32_103 dim 1 : vector<2x128xf32>, i32 -> vector<2x128xf32>
    %161 = arith.addf %159, %160 : vector<2x128xf32>
    %c64_i32_104 = arith.constant 64 : i32
    %162 = tpu.dynamic_rotate %161 by %c64_i32_104 dim 1 : vector<2x128xf32>, i32 -> vector<2x128xf32>
    %163 = arith.addf %161, %162 : vector<2x128xf32>
    %cst_105 = arith.constant 3.906250e-03 : f32
    %164 = vector.broadcast %cst_105 : f32 to vector<2x128xf32>
    %165 = arith.mulf %163, %164 : vector<2x128xf32>
    %cst_106 = arith.constant 9.99999974E-6 : f32
    %166 = vector.broadcast %cst_106 : f32 to vector<2x128xf32>
    %167 = arith.addf %165, %166 : vector<2x128xf32>
    %168 = math.rsqrt %167 : vector<2x128xf32>
    %169 = vector.shape_cast %168 : vector<2x128xf32> to vector<2x1x128xf32>
    %170 = vector.broadcast %169 : vector<2x1x128xf32> to vector<2x16x128xf32>
    %171 = arith.mulf %153, %170 : vector<2x16x128xf32>
    %cst_107 = arith.constant 0.000000e+00 : f32
    %172 = vector.broadcast %cst_107 : f32 to vector<2x16x128xf32>
    %173 = arith.maximumf %171, %172 : vector<2x16x128xf32>
    %c0_108 = arith.constant 0 : index
    %c1_109 = arith.constant 1 : index
    %c0_110 = arith.constant 0 : index
    %174 = vector.load %arg4[%c0_108, %c1_109, %c0_110] : memref<2x18x128xf32, #tpu.memory_space<vmem>>, vector<2x16x128xf32>
    tpu.vector_store %arg4[%c0_108, %c1_109, %c0_110], %173 {strides = array<i32>} : memref<2x18x128xf32, #tpu.memory_space<vmem>>, vector<2x16x128xf32>,
    %c0_111 = arith.constant 0 : index
    %c0_112 = arith.constant 0 : index
    %c0_113 = arith.constant 0 : index
    %175 = vector.load %arg4[%c0_111, %c0_112, %c0_113] : memref<2x18x128xf32, #tpu.memory_space<vmem>>, vector<2x18x128xf32>
    %176 = arith.truncf %175 : vector<2x18x128xf32> to vector<2x18x128xbf16>
    %cst_114 = arith.constant 0.000000e+00 : f32
    %177 = vector.broadcast %cst_114 : f32 to vector<32x128xf32>
    %178 = vector.extract_strided_slice %176 {offsets = [0, 0, 0], sizes = [2, 16, 128], strides = [1, 1, 1]} : vector<2x18x128xbf16> to vector<2x16x128xbf16>
    %179 = vector.shape_cast %178 : vector<2x16x128xbf16> to vector<32x128xbf16>
    %c3 = arith.constant 3 : index
    %c0_115 = arith.constant 0 : index
    %c0_116 = arith.constant 0 : index
    %c0_117 = arith.constant 0 : index
    %180 = vector.load %arg2[%c3, %c0_115, %c0_116, %c0_117] : memref<4x3x128x128xbf16, #tpu.memory_space<vmem>>, vector<1x1x128x128xbf16>
    %181 = vector.shape_cast %180 : vector<1x1x128x128xbf16> to vector<128x128xbf16>
    %cst_118 = arith.constant dense<0.000000e+00> : vector<32x128xf32>
    %182 = tpu.matmul %179, %181, %cst_118 {dimension_numbers = #tpu.dot_dimension_numbers<[1], [0], [0], [1], [0, 0, 1, 1], [], []>} : vector<32x128xbf16>, vector<128x128xbf16>, vector<32x128xf32> -> vector<32x128xf32>
    %183 = arith.addf %177, %182 : vector<32x128xf32>
    %184 = vector.extract_strided_slice %176 {offsets = [0, 1, 0], sizes = [2, 16, 128], strides = [1, 1, 1]} : vector<2x18x128xbf16> to vector<2x16x128xbf16>
    %185 = vector.shape_cast %184 : vector<2x16x128xbf16> to vector<32x128xbf16>
    %c3_119 = arith.constant 3 : index
    %c1_120 = arith.constant 1 : index
    %c0_121 = arith.constant 0 : index
    %c0_122 = arith.constant 0 : index
    %186 = vector.load %arg2[%c3_119, %c1_120, %c0_121, %c0_122] : memref<4x3x128x128xbf16, #tpu.memory_space<vmem>>, vector<1x1x128x128xbf16>
    %187 = vector.shape_cast %186 : vector<1x1x128x128xbf16> to vector<128x128xbf16>
    %cst_123 = arith.constant dense<0.000000e+00> : vector<32x128xf32>
    %188 = tpu.matmul %185, %187, %cst_123 {dimension_numbers = #tpu.dot_dimension_numbers<[1], [0], [0], [1], [0, 0, 1, 1], [], []>} : vector<32x128xbf16>, vector<128x128xbf16>, vector<32x128xf32> -> vector<32x128xf32>
    %189 = arith.addf %183, %188 : vector<32x128xf32>
    %190 = vector.extract_strided_slice %176 {offsets = [0, 2, 0], sizes = [2, 16, 128], strides = [1, 1, 1]} : vector<2x18x128xbf16> to vector<2x16x128xbf16>
    %191 = vector.shape_cast %190 : vector<2x16x128xbf16> to vector<32x128xbf16>
    %c3_124 = arith.constant 3 : index
    %c2_125 = arith.constant 2 : index
    %c0_126 = arith.constant 0 : index
    %c0_127 = arith.constant 0 : index
    %192 = vector.load %arg2[%c3_124, %c2_125, %c0_126, %c0_127] : memref<4x3x128x128xbf16, #tpu.memory_space<vmem>>, vector<1x1x128x128xbf16>
    %193 = vector.shape_cast %192 : vector<1x1x128x128xbf16> to vector<128x128xbf16>
    %cst_128 = arith.constant dense<0.000000e+00> : vector<32x128xf32>
    %194 = tpu.matmul %191, %193, %cst_128 {dimension_numbers = #tpu.dot_dimension_numbers<[1], [0], [0], [1], [0, 0, 1, 1], [], []>} : vector<32x128xbf16>, vector<128x128xbf16>, vector<32x128xf32> -> vector<32x128xf32>
    %195 = arith.addf %189, %194 : vector<32x128xf32>
    %196 = vector.shape_cast %195 : vector<32x128xf32> to vector<2x16x128xf32>
    %cst_129 = arith.constant dense<0.000000e+00> : vector<2x128xf32>
    %197 = vector.multi_reduction <add>, %196, %cst_129 [1] : vector<2x16x128xf32> to vector<2x128xf32>
    %c8_i32_130 = arith.constant 8 : i32
    %198 = tpu.dynamic_rotate %197 by %c8_i32_130 dim 1 : vector<2x128xf32>, i32 -> vector<2x128xf32>
    %199 = arith.addf %197, %198 : vector<2x128xf32>
    %c16_i32_131 = arith.constant 16 : i32
    %200 = tpu.dynamic_rotate %199 by %c16_i32_131 dim 1 : vector<2x128xf32>, i32 -> vector<2x128xf32>
    %201 = arith.addf %199, %200 : vector<2x128xf32>
    %c32_i32_132 = arith.constant 32 : i32
    %202 = tpu.dynamic_rotate %201 by %c32_i32_132 dim 1 : vector<2x128xf32>, i32 -> vector<2x128xf32>
    %203 = arith.addf %201, %202 : vector<2x128xf32>
    %c64_i32_133 = arith.constant 64 : i32
    %204 = tpu.dynamic_rotate %203 by %c64_i32_133 dim 1 : vector<2x128xf32>, i32 -> vector<2x128xf32>
    %205 = arith.addf %203, %204 : vector<2x128xf32>
    %cst_134 = arith.constant 3.906250e-03 : f32
    %206 = vector.broadcast %cst_134 : f32 to vector<2x128xf32>
    %207 = arith.mulf %205, %206 : vector<2x128xf32>
    %208 = vector.shape_cast %207 : vector<2x128xf32> to vector<2x1x128xf32>
    %209 = vector.broadcast %208 : vector<2x1x128xf32> to vector<2x16x128xf32>
    %210 = arith.subf %196, %209 : vector<2x16x128xf32>
    %211 = arith.mulf %210, %210 : vector<2x16x128xf32>
    %cst_135 = arith.constant dense<0.000000e+00> : vector<2x128xf32>
    %212 = vector.multi_reduction <add>, %211, %cst_135 [1] : vector<2x16x128xf32> to vector<2x128xf32>
    %c8_i32_136 = arith.constant 8 : i32
    %213 = tpu.dynamic_rotate %212 by %c8_i32_136 dim 1 : vector<2x128xf32>, i32 -> vector<2x128xf32>
    %214 = arith.addf %212, %213 : vector<2x128xf32>
    %c16_i32_137 = arith.constant 16 : i32
    %215 = tpu.dynamic_rotate %214 by %c16_i32_137 dim 1 : vector<2x128xf32>, i32 -> vector<2x128xf32>
    %216 = arith.addf %214, %215 : vector<2x128xf32>
    %c32_i32_138 = arith.constant 32 : i32
    %217 = tpu.dynamic_rotate %216 by %c32_i32_138 dim 1 : vector<2x128xf32>, i32 -> vector<2x128xf32>
    %218 = arith.addf %216, %217 : vector<2x128xf32>
    %c64_i32_139 = arith.constant 64 : i32
    %219 = tpu.dynamic_rotate %218 by %c64_i32_139 dim 1 : vector<2x128xf32>, i32 -> vector<2x128xf32>
    %220 = arith.addf %218, %219 : vector<2x128xf32>
    %cst_140 = arith.constant 3.906250e-03 : f32
    %221 = vector.broadcast %cst_140 : f32 to vector<2x128xf32>
    %222 = arith.mulf %220, %221 : vector<2x128xf32>
    %cst_141 = arith.constant 9.99999974E-6 : f32
    %223 = vector.broadcast %cst_141 : f32 to vector<2x128xf32>
    %224 = arith.addf %222, %223 : vector<2x128xf32>
    %225 = math.rsqrt %224 : vector<2x128xf32>
    %226 = vector.shape_cast %225 : vector<2x128xf32> to vector<2x1x128xf32>
    %227 = vector.broadcast %226 : vector<2x1x128xf32> to vector<2x16x128xf32>
    %228 = arith.mulf %210, %227 : vector<2x16x128xf32>
    %229 = arith.addf %116, %228 : vector<2x16x128xf32>
    %c0_142 = arith.constant 0 : index
    %c0_143 = arith.constant 0 : index
    %c0_144 = arith.constant 0 : index
    %230 = vector.load %arg3[%c0_142, %c0_143, %c0_144] : memref<2x16x128xf32, #tpu.memory_space<vmem>>, vector<2x16x128xf32>
    tpu.vector_store %arg3[%c0_142, %c0_143, %c0_144], %229 {strides = array<i32>} : memref<2x16x128xf32, #tpu.memory_space<vmem>>, vector<2x16x128xf32>,
    return
  }
  func.func @transform_0(%arg0: i32) -> (i32, i32, i32) {
    %c0_i32 = arith.constant 0 : i32
    %c0_i32_0 = arith.constant 0 : i32
    %c0_i32_1 = arith.constant 0 : i32
    return %arg0, %c0_i32, %c0_i32_0 : i32, i32, i32
  }
  func.func @transform_1(%arg0: i32) -> (i32, i32, i32, i32) {
    %c0_i32 = arith.constant 0 : i32
    %c0_i32_0 = arith.constant 0 : i32
    %c0_i32_1 = arith.constant 0 : i32
    %c0_i32_2 = arith.constant 0 : i32
    %c0_i32_3 = arith.constant 0 : i32
    return %c0_i32, %c0_i32_0, %c0_i32_1, %c0_i32_2 : i32, i32, i32, i32
  }
  func.func @transform_2(%arg0: i32) -> (i32, i32, i32) {
    %c0_i32 = arith.constant 0 : i32
    %c0_i32_0 = arith.constant 0 : i32
    %c0_i32_1 = arith.constant 0 : i32
    return %arg0, %c0_i32, %c0_i32_0 : i32, i32, i32
  }
}

</mosaic_0001>

<bundles_post_ra>
// kernel: tpu_custom_call.1
= control target key start
LH: loop header
LB: loop body
LE: loop exit
PB: predicated region body
PF: predicated region fallthrough
CT: control target
= control target key end

     0   :  { %7 = vsyncpa [#allocation4], 0  ;;  %s3296_s0 = inlined_call_operand.hbm [shape: f32[2,16,128], index: 0, kind: input, shape index: {}]   ;;  %s3297_s1 = inlined_call_operand.hbm [shape: bf16[4,3,128,128], index: 1, kind: input, shape index: {}]   ;;  %s3298_s2 = inlined_call_operand.hbm [shape: f32[2,16,128], index: 2, kind: output, shape index: {}]  }
   0x1   :  { %8 = vsyncpa [#allocation7], 0 }
   0x2   :  { %9 = vsyncpa [#allocation5], 0  ;;  %s3027_s9 = smov [#allocation3]   ;;  %s2955_s13 = scalar_lea.hbm %s3296_s0, 512 }
   0x3   :  { %s15_s10 = sshll.u32 %s3027_s9, 4  ;;  %p2956_p0 = scmp.ne.s32.totalorder %s3296_s0, %s2955_s13  ;;  %s16_s10 = int_to_ptr.vmem [resolvable:$true] %s15_s10 }
   0x4   :  { %p2959_p1 = scmp.lt.u32.totalorder %s2955_s13, %s3296_s0 }
   0x6   :  { %p2961_p2 = pnand %p2959_p1, %p2956_p0 }
   0x8   :  { %2964 = shalt.err (!%p2961_p2)
}
   0x9   :  { %s2965_s18 = scalar_lea.vmem %s16_s10, 512  ;;  %p2970_p4 = scmp.lt.s32.totalorder %s16_s10, %s16_s10 }
   0xa   :  { %p2966_p3 = scmp.ne.s32.totalorder %s16_s10, %s2965_s18  ;;  %p2971_p5 = scmp.lt.s32.totalorder %s2965_s18, %s2965_s18 }
   0xc   :  { %p2972_p6 = por %p2971_p5, %p2970_p4 }
   0xe   :  { %p2973_p7 = pnand %p2972_p6, %p2966_p3 }
  0x10   :  { %2976 = shalt.err (!%p2973_p7)
}
  0x11   :  { %s3028_s19 = smov 128   ;;  %s3029_s20 = smov 8  }
  0x12   :  { %21 = dma.hbm_to_vmem [thread:$0]  %s3296_s0, 512, %s16_s10, [#allocation4], %s3028_s19, %s3028_s19, %s3029_s20  }
  0x13   :  { %s3030_s23 = smov [#allocation6]   ;;  %s2977_s27 = scalar_lea.hbm %s3297_s1, 12288 }
  0x14   :  { %s27_s24 = sshll.u32 %s3030_s23, 4  ;;  %p2978_p8 = scmp.ne.s32.totalorder %s3297_s1, %s2977_s27  ;;  %s28_s24 = int_to_ptr.vmem [resolvable:$true] %s27_s24 }
  0x15   :  { %p2981_p9 = scmp.lt.u32.totalorder %s2977_s27, %s3297_s1 }
  0x17   :  { %p2983_p10 = pnand %p2981_p9, %p2978_p8 }
  0x19   :  { %2986 = shalt.err (!%p2983_p10)
}
  0x1a   :  { %s2987_s4 = scalar_lea.vmem %s28_s24, 12288  ;;  %p2992_p12 = scmp.lt.s32.totalorder %s28_s24, %s28_s24 }
  0x1b   :  { %p2988_p11 = scmp.ne.s32.totalorder %s28_s24, %s2987_s4  ;;  %p2993_p13 = scmp.lt.s32.totalorder %s2987_s4, %s2987_s4 }
  0x1d   :  { %p2994_p0 = por %p2993_p13, %p2992_p12 }
  0x1f   :  { %p2995_p1 = pnand %p2994_p0, %p2988_p11 }
  0x21   :  { %2998 = shalt.err (!%p2995_p1)
}
  0x22   :  { %s3031_s0 = smov 64   ;;  %s3032_s5 = smov 4  }
  0x23   :  { %33 = dma.hbm_to_vmem [thread:$0]  %s3297_s1, 12288, %s28_s24, [#allocation7], %s3031_s0, %s3031_s0, %s3032_s5  }
  0x24   :  { %3021 = dma.done.wait [#allocation4], 512  }
  0x25   :  { %3022 = vsyncadd [#allocation4], 4294966784 }
  0x26   :  { %3023 = dma.done.wait [#allocation7], 12288  }
  0x27   :  { %3024 = vsyncadd [#allocation7], 4294955008  ;;  %v3033_v0 = vmov 0.0   ;;  %v2843_v1 = vld [vmem:[#allocation6 + $0x40] sm:$0xff]   ;;  %v2844_v2 = vld [vmem:[#allocation6 + $0x48] sm:$0xff]   ;;  %vm321_vm1 = vcmask 1046528  }
  0x28   :  { %41 = vst [vmem:[#allocation2] sm:$0x1] %v3033_v0  ;;  %42 = vst [vmem:[#allocation2 + $0x18] sm:$0x1] %v3033_v0  ;;  %2561 = vmatprep.subr.bf16.mxu0 %v2843_v1  ;;  %v2845_v3 = vld [vmem:[#allocation6 + $0x50] sm:$0xff]   ;;  %v2846_v4 = vld [vmem:[#allocation6 + $0x58] sm:$0xff]  }
  0x29   :  { %43 = vst [vmem:[#allocation2 + $0x11] sm:$0x1] %v3033_v0  ;;  %44 = vst [vmem:[#allocation2 + $0x29] sm:$0x1] %v3033_v0  ;;  %2562 = vmatpush3.bf16.msra.mxu0 %v2843_v1  ;;  %v3081_v5 = vld [vmem:[#allocation3] sm:$0xff]  ;;  %v3083_v6 = vld [vmem:[#allocation3 + $0x8] sm:$0xff] }
  0x2a   :  { %2563 = vmatprep.subr.bf16.mxu0 %v2844_v2  ;;  %49 = vst [vmem:[#allocation2 + $0x1] sm:$0xff] %v3081_v5  ;;  %50 = vst [vmem:[#allocation2 + $0x9] sm:$0xff] %v3083_v6  ;;  %v3087_v7 = vld [vmem:[#allocation3 + $0x10] sm:$0xff]  ;;  %v3089_v8 = vld [vmem:[#allocation3 + $0x18] sm:$0xff]  ;;  %vm79_vm0 = vsmask.f32 7424 }
  0x2b   :  { %51 = vst [vmem:[#allocation2 + $0x19] sm:$0xff] %v3087_v7  ;;  %52 = vst [vmem:[#allocation2 + $0x21] sm:$0xff] %v3089_v8  ;;  %v2847_v9 = vld [vmem:[#allocation6 + $0x60] sm:$0xff]   ;;  %v2848_v10 = vld [vmem:[#allocation6 + $0x68] sm:$0xff]   ;;  %vm464_vm2 = vcmask 1041409   ;;  %s3034_s1 = smov 16  }
  0x2c   :  { %v2849_v23 = vld [vmem:[#allocation6 + $0x70] sm:$0xff]   ;;  %v2850_v32 = vld [vmem:[#allocation6 + $0x78] sm:$0xff]   ;;  %v2851_v34 = vld [vmem:[#allocation6] sm:$0xff]   ;;  %s3035_s8 = smov 32   ;;  %s3036_s9 = smov [#allocation8]  }
  0x2d   :  { %2564 = vmatpush3.bf16.msra.mxu0 %v2844_v2  ;;  %v2852_v42 = vld [vmem:[#allocation6 + $0x8] sm:$0xff]   ;;  %v2853_v44 = vld [vmem:[#allocation6 + $0x10] sm:$0xff]   ;;  %v2854_v45 = vld [vmem:[#allocation6 + $0x18] sm:$0xff]   ;;  %s2332_s10 = sshll.u32 %s3036_s9, 4  ;;  %s2333_s10 = int_to_ptr.vmem [resolvable:$true] %s2332_s10 }
  0x2e   :  { %2565 = vmatprep.subr.bf16.mxu0 %v2845_v3  ;;  %v2855_v46 = vld [vmem:[#allocation6 + $0x20] sm:$0xff]   ;;  %v2856_v47 = vld [vmem:[#allocation6 + $0x28] sm:$0xff]   ;;  %v2857_v48 = vld [vmem:[#allocation6 + $0x30] sm:$0xff]   ;;  %s2999_s11 = scalar_lea.vmem %s2333_s10, 512  ;;  %p3004_p3 = scmp.lt.s32.totalorder %s2333_s10, %s2333_s10 }
  0x2f   :  { %v2858_v49 = vld [vmem:[#allocation6 + $0x38] sm:$0xff]   ;;  %v2859_v50 = vld [vmem:[#allocation6 + $0x80] sm:$0xff]   ;;  %v2860_v51 = vld [vmem:[#allocation6 + $0x88] sm:$0xff]   ;;  %p3000_p2 = scmp.ne.s32.totalorder %s2333_s10, %s2999_s11  ;;  %p3005_p4 = scmp.lt.s32.totalorder %s2999_s11, %s2999_s11 }
  0x30   :  { %v2861_v53 = vld [vmem:[#allocation6 + $0x90] sm:$0xff]   ;;  %v2862_v54 = vld [vmem:[#allocation6 + $0x98] sm:$0xff]   ;;  %v2863_v55 = vld [vmem:[#allocation6 + $0xa0] sm:$0xff]  }
  0x31   :  { %2566 = vmatpush3.bf16.msra.mxu0 %v2845_v3  ;;  %v53_v11 = vld [vmem:[#allocation2] sm:$0xff]  ;;  %v54_v12 = vld [vmem:[#allocation2 + $0x8] sm:$0xff]  ;;  %v55_v13 = vld [vmem:[#allocation2 + $0x10] sm:$0x3]  ;;  %p3006_p5 = por %p3005_p4, %p3004_p3 }
  0x32   :  { %2567 = vmatprep.subr.bf16.mxu0 %v2846_v4  ;;  %v3093_v14 = vpack.c.bf16 %v54_v12, %v53_v11  ;;  %v3095_v15 = vpack.c.bf16 %v55_v13, %v55_v13  ;;  %v56_v16 = vld [vmem:[#allocation2 + $0x18] sm:$0xff]  ;;  %v57_v17 = vld [vmem:[#allocation2 + $0x20] sm:$0xff]  ;;  %v58_v18 = vld [vmem:[#allocation2 + $0x28] sm:$0x3] }
  0x33   :  { %v61_v22 = vpack.c.bf16 %v57_v17, %v56_v16  ;;  %v62_v24 = vpack.c.bf16 %v58_v18, %v58_v18  ;;  %v2864_v56 = vld [vmem:[#allocation6 + $0xa8] sm:$0xff]   ;;  %v2865_v57 = vld [vmem:[#allocation6 + $0xb0] sm:$0xff]   ;;  %v2866_v58 = vld [vmem:[#allocation6 + $0xb8] sm:$0xff]   ;;  %p3007_p6 = pnand %p3006_p5, %p3000_p2 }
  0x34   :  { %v81_v19 = vshrl.u32 %v3093_v14, 16  ;;  %v83_v20 = vshll.u32 %v3093_v14, 16  ;;  %v88_v21 = vshll.u32 %v3095_v15, 16  ;;  %v322_v39 = vrot.slane %v3093_v14, 1 }
  0x35   :  { %2568 = vmatpush3.bf16.msra.mxu0 %v2846_v4  ;;  %v95_v27 = vshll.u32 %v61_v22, 16  ;;  %v93_v28 = vshrl.u32 %v61_v22, 16  ;;  %v100_v31 = vshll.u32 %v62_v24, 16  ;;  %v325_v35 = vrot.slane %v61_v22, 1 }
  0x36   :  { %2569 = vmatprep.subr.bf16.mxu0 %v2847_v9  ;;  %v85_v25 = vrot.slane %v83_v20, 1  ;;  %v90_v26 = vrot.slane %v88_v21, 1  ;;  %v326_v38 = vrot.slane %v62_v24, 1  ;;  %v323_v40 = vrot.slane %v3095_v15, 1 }
  0x37   :  { %v97_v30 = vrot.slane %v95_v27, 1  ;;  %v102_v37 = vrot.slane %v100_v31, 1 }
  0x38   :  { %v86_v29 = vor.u32 %v85_v25, %v81_v19  ;;  %v327_v41 = vsel %vm321_vm1, %v325_v35, %v326_v38  ;;  %v324_v52 = vsel %vm321_vm1, %v322_v39, %v323_v40 }
  0x39   :  { %2570 = vmatpush3.bf16.msra.mxu0 %v2847_v9  ;;  %v98_v36 = vor.u32 %v97_v30, %v93_v28 }
  0x3a   :  { %2571 = vmatprep.subr.bf16.mxu0 %v2848_v10  ;;  %v91_v33 = vsel %vm79_vm0, %v86_v29, %v90_v26 }
  0x3b   :  { %2577 = vmatprep.mubr.bf16.mxu0 %v91_v33  ;;  %v103_v43 = vsel %vm79_vm0, %v98_v36, %v102_v37  ;;  %v516_v36 = vlaneseq }
  0x3d   :  { %2572 = vmatpush3.bf16.msra.mxu0 %v2848_v10  ;;  %v517_v37 = vshrl.u32 %v516_v36, 7  ;;  %v2875_v36 = vld [vmem:[#allocation6 + $0xc0] sm:$0xff]  }
  0x3e   :  { %2573 = vmatprep.subr.bf16.mxu0 %v2849_v23 }
  0x3f   :  { %v3115_v39 = vsub.s32 0, %v517_v37 }
  0x41   :  { %2574 = vmatpush3.bf16.msra.mxu0 %v2849_v23 }
  0x42   :  { %2575 = vmatprep.subr.bf16.mxu0 %v2850_v32 }
  0x45   :  { %2576 = vmatpush3.bf16.msra.mxu0 %v2850_v32 }
  0x46   :  { %2581 = vmatprep.subr.bf16.mxu0 %v2851_v34 }
  0x48   :  { %2578 = vmatmul.mubr.bf16.vlgmr.msra.gmra.mrb[0].mxu0 %v103_v43 }
  0x49   :  { %2582 = vmatpush3.bf16.msra.mxu0 %v2851_v34  ;;  %2597 = vmatprep.mubr.bf16.mxu0 %v3093_v14 }
  0x4a   :  { %2583 = vmatprep.subr.bf16.mxu0 %v2852_v42 }
  0x4d   :  { %2584 = vmatpush3.bf16.msra.mxu0 %v2852_v42 }
  0x4e   :  { %2585 = vmatprep.subr.bf16.mxu0 %v2853_v44 }
  0x51   :  { %2586 = vmatpush3.bf16.msra.mxu0 %v2853_v44 }
  0x52   :  { %2587 = vmatprep.subr.bf16.mxu0 %v2854_v45 }
  0x55   :  { %2588 = vmatpush3.bf16.msra.mxu0 %v2854_v45 }
  0x56   :  { %2589 = vmatprep.subr.bf16.mxu0 %v2855_v46 }
  0x59   :  { %2590 = vmatpush3.bf16.msra.mxu0 %v2855_v46 }
  0x5a   :  { %2591 = vmatprep.subr.bf16.mxu0 %v2856_v47 }
  0x5d   :  { %2592 = vmatpush3.bf16.msra.mxu0 %v2856_v47 }
  0x5e   :  { %2593 = vmatprep.subr.bf16.mxu0 %v2857_v48 }
  0x61   :  { %2594 = vmatpush3.bf16.msra.mxu0 %v2857_v48 }
  0x62   :  { %2595 = vmatprep.subr.bf16.mxu0 %v2858_v49 }
  0x65   :  { %2596 = vmatpush3.bf16.msra.mxu0 %v2858_v49 }
  0x66   :  { %2601 = vmatprep.subr.bf16.mxu0 %v2859_v50 }
  0x68   :  { %2598 = vmatmul.mubr.bf16.vlgmr.msra.gmra.mrb[0].mxu0 %v61_v22 }
  0x69   :  { %2602 = vmatpush3.bf16.msra.mxu0 %v2859_v50  ;;  %2617 = vmatprep.mubr.bf16.mxu0 %v324_v52 }
  0x6a   :  { %2603 = vmatprep.subr.bf16.mxu0 %v2860_v51 }
  0x6d   :  { %2604 = vmatpush3.bf16.msra.mxu0 %v2860_v51 }
  0x6e   :  { %2605 = vmatprep.subr.bf16.mxu0 %v2861_v53 }
  0x71   :  { %2606 = vmatpush3.bf16.msra.mxu0 %v2861_v53 }
  0x72   :  { %2607 = vmatprep.subr.bf16.mxu0 %v2862_v54 }
  0x75   :  { %2608 = vmatpush3.bf16.msra.mxu0 %v2862_v54 }
  0x76   :  { %2609 = vmatprep.subr.bf16.mxu0 %v2863_v55 }
  0x79   :  { %2610 = vmatpush3.bf16.msra.mxu0 %v2863_v55 }
  0x7a   :  { %2611 = vmatprep.subr.bf16.mxu0 %v2864_v56 }
  0x7d   :  { %2612 = vmatpush3.bf16.msra.mxu0 %v2864_v56 }
  0x7e   :  { %2613 = vmatprep.subr.bf16.mxu0 %v2865_v57 }
  0x81   :  { %2614 = vmatpush3.bf16.msra.mxu0 %v2865_v57 }
  0x82   :  { %2615 = vmatprep.subr.bf16.mxu0 %v2866_v58 }
  0x85   :  { %2616 = vmatpush3.bf16.msra.mxu0 %v2866_v58 }
  0x88   :  { %2618 = vmatmul.mubr.bf16.vlgmr.msra.gmra.mrb[0].mxu0 %v327_v41 }
 0x15b   :  { %v2619_v59 = vpop.f32.mrb[0].mxu0 }
 0x15c   :  { %v429_v60 = vpop.f32.mrb[1].mxu0 }
 0x15d   :  { %v2620_v61 = vpop.f32.mrb[2].mxu0 }
 0x15e   :  { %v455_v62 = vadd.f32 %v2620_v61, %v2619_v59  ;;  %v432_v63 = vpop.f32.mrb[3].mxu0 }
 0x15f   :  { %v448_v0 = vadd.f32 %v432_v63, %v429_v60 }
 0x160   :  { %v456_v1 = vrot.slane %v455_v62, 4 }
 0x161   :  { %v449_v2 = vrot.slane %v448_v0, 4 }
 0x162   :  { %v457_v3 = vadd.f32 %v456_v1, %v455_v62 }
 0x163   :  { %v450_v4 = vadd.f32 %v449_v2, %v448_v0 }
 0x164   :  { %v458_v9 = vrot.slane %v457_v3, 2 }
 0x165   :  { %v451_v10 = vrot.slane %v450_v4, 2 }
 0x166   :  { %v459_v11 = vadd.f32 %v458_v9, %v457_v3 }
 0x167   :  { %v452_v12 = vadd.f32 %v451_v10, %v450_v4 }
 0x168   :  { %v460_v13 = vrot.slane %v459_v11, 1 }
 0x169   :  { %v453_v14 = vrot.slane %v452_v12, 1 }
 0x16a   :  { %v461_v15 = vadd.f32 %v460_v13, %v459_v11 }
 0x16b   :  { %v454_v16 = vadd.f32 %v453_v14, %v452_v12 }
 0x16d   :  { %v465_v17 = vsel %vm464_vm2, %v461_v15, %v454_v16 }
 0x16e   :  { %467 = vrot.lane.b32.xlu0 %v465_v17, %s3029_s20 }
 0x1e0   :  { %v468_v18 = vpop.permute.xlu0 %467 }
 0x1e1   :  { %v470_v19 = vrot.slane %v468_v18, 1  ;;  %v473_v21 = vadd.f32 %v468_v18, %v454_v16 }
 0x1e3   :  { %v474_v20 = vadd.f32 %v470_v19, %v461_v15 }
 0x1e5   :  { %v477_v22 = vrot.slane %v474_v20, 7 }
 0x1e7   :  { %v478_v23 = vsel %vm464_vm2, %v477_v22, %v473_v21 }
 0x1e8   :  { %480 = vrot.lane.b32.xlu0 %v478_v23, %s3034_s1 }
 0x25a   :  { %v481_v24 = vpop.permute.xlu0 %480 }
 0x25b   :  { %v483_v25 = vrot.slane %v481_v24, 1  ;;  %v486_v27 = vadd.f32 %v481_v24, %v473_v21  ;;  %v2867_v24 = vld [vmem:[#allocation6 + $0x100] sm:$0xff]  }
 0x25c   :  { %2621 = vmatprep.subr.bf16.mxu1 %v2867_v24 }
 0x25d   :  { %v487_v26 = vadd.f32 %v483_v25, %v474_v20  ;;  %2622 = vmatpush3.bf16.msra.mxu1 %v2867_v24  ;;  %v2876_v24 = vld [vmem:[#allocation6 + $0xc8] sm:$0xff]  }
 0x25f   :  { %v490_v28 = vrot.slane %v487_v26, 7 }
 0x261   :  { %v491_v29 = vsel %vm464_vm2, %v490_v28, %v486_v27  ;;  %v2868_v28 = vld [vmem:[#allocation6 + $0x108] sm:$0xff]  }
 0x262   :  { %493 = vrot.lane.b32.xlu1 %v491_v29, %s3035_s8  ;;  %2623 = vmatprep.subr.bf16.mxu1 %v2868_v28 }
 0x263   :  { %2624 = vmatpush3.bf16.msra.mxu1 %v2868_v28  ;;  %v2879_v28 = vld [vmem:[#allocation6 + $0xe0] sm:$0xff]  }
 0x2d4   :  { %v494_v30 = vpop.permute.xlu1 %493 }
 0x2d5   :  { %v496_v31 = vrot.slane %v494_v30, 1  ;;  %v499_v33 = vadd.f32 %v494_v30, %v486_v27  ;;  %v2869_v30 = vld [vmem:[#allocation6 + $0x110] sm:$0xff]  }
 0x2d6   :  { %2625 = vmatprep.subr.bf16.mxu1 %v2869_v30 }
 0x2d7   :  { %v500_v32 = vadd.f32 %v496_v31, %v487_v26  ;;  %2626 = vmatpush3.bf16.msra.mxu1 %v2869_v30  ;;  %v2870_v31 = vld [vmem:[#allocation6 + $0x118] sm:$0xff]   ;;  %v2881_v30 = vld [vmem:[#allocation6 + $0xf0] sm:$0xff]  }
 0x2d8   :  { %2627 = vmatprep.subr.bf16.mxu1 %v2870_v31 }
 0x2d9   :  { %v503_v34 = vrot.slane %v500_v32, 7 }
 0x2db   :  { %v504_v35 = vsel %vm464_vm2, %v503_v34, %v499_v33  ;;  %2628 = vmatpush3.bf16.msra.mxu1 %v2870_v31  ;;  %v2873_v34 = vld [vmem:[#allocation6 + $0x130] sm:$0xff]   ;;  %v2882_v31 = vld [vmem:[#allocation6 + $0xf8] sm:$0xff]  }
 0x2dc   :  { %506 = vrot.lane.b32.xlu1 %v504_v35, %s3031_s0  ;;  %v2874_v35 = vld [vmem:[#allocation6 + $0x138] sm:$0xff]  }
 0x34e   :  { %v507_v38 = vpop.permute.xlu1 %506 }
 0x34f   :  { %v509_v40 = vrot.slane %v507_v38, 1  ;;  %v512_v41 = vadd.f32 %v507_v38, %v499_v33  ;;  %v2872_v33 = vld [vmem:[#allocation6 + $0x128] sm:$0xff]  }
 0x351   :  { %v513_v42 = vadd.f32 %v509_v40, %v500_v32  ;;  %v514_v43 = vmul.f32 0.00390625, %v512_v41  ;;  %v2871_v32 = vld [vmem:[#allocation6 + $0x120] sm:$0xff]  }
 0x352   :  { %2629 = vmatprep.subr.bf16.mxu1 %v2871_v32 }
 0x353   :  { %v515_v44 = vmul.f32 0.00390625, %v513_v42  ;;  %v519_v45 = vrot.slane %v514_v43, %v3115_v39  ;;  %2630 = vmatpush3.bf16.msra.mxu1 %v2871_v32  ;;  %v2883_v32 = vld [vmem:[#allocation6 + $0x140] sm:$0xff]  }
 0x354   :  { %2631 = vmatprep.subr.bf16.mxu1 %v2872_v33 }
 0x355   :  { %v523_v46 = vrot.slane %v515_v44, %v3115_v39  ;;  %v3119_v47 = vsub.f32 %v429_v60, %v519_v45  ;;  %v3121_v48 = vsub.f32 %v432_v63, %v519_v45 }
 0x357   :  { %v3123_v49 = vsub.f32 %v2619_v59, %v523_v46  ;;  %v3125_v50 = vsub.f32 %v2620_v61, %v523_v46  ;;  %v528_v51 = vmul.f32 %v3119_v47, %v3119_v47  ;;  %v529_v52 = vmul.f32 %v3121_v48, %v3121_v48  ;;  %2632 = vmatpush3.bf16.msra.mxu1 %v2872_v33 }
 0x358   :  { %2633 = vmatprep.subr.bf16.mxu1 %v2873_v34 }
 0x359   :  { %v530_v53 = vmul.f32 %v3123_v49, %v3123_v49  ;;  %v531_v54 = vmul.f32 %v3125_v50, %v3125_v50  ;;  %v532_v55 = vadd.f32 %v529_v52, %v528_v51 }
 0x35b   :  { %v533_v56 = vrot.slane %v532_v55, 4  ;;  %v539_v57 = vadd.f32 %v531_v54, %v530_v53  ;;  %2634 = vmatpush3.bf16.msra.mxu1 %v2873_v34 }
 0x35c   :  { %2635 = vmatprep.subr.bf16.mxu1 %v2874_v35 }
 0x35d   :  { %v534_v58 = vadd.f32 %v533_v56, %v532_v55  ;;  %v540_v59 = vrot.slane %v539_v57, 4 }
 0x35f   :  { %v535_v60 = vrot.slane %v534_v58, 2  ;;  %v541_v61 = vadd.f32 %v540_v59, %v539_v57  ;;  %2636 = vmatpush3.bf16.msra.mxu1 %v2874_v35  ;;  %v2884_v35 = vld [vmem:[#allocation6 + $0x148] sm:$0xff]  }
 0x360   :  { %2641 = vmatprep.subr.bf16.mxu1 %v2875_v36 }
 0x361   :  { %v536_v62 = vadd.f32 %v535_v60, %v534_v58  ;;  %v542_v63 = vrot.slane %v541_v61, 2 }
 0x363   :  { %v537_v0 = vrot.slane %v536_v62, 1  ;;  %v543_v1 = vadd.f32 %v542_v63, %v541_v61 }
 0x365   :  { %v544_v2 = vrot.slane %v543_v1, 1  ;;  %v538_v3 = vadd.f32 %v537_v0, %v536_v62 }
 0x367   :  { %v545_v4 = vadd.f32 %v544_v2, %v543_v1 }
 0x369   :  { %v548_v9 = vsel %vm464_vm2, %v545_v4, %v538_v3 }
 0x36a   :  { %550 = vrot.lane.b32.xlu0 %v548_v9, %s3029_s20 }
 0x3dc   :  { %v551_v10 = vpop.permute.xlu0 %550 }
 0x3dd   :  { %v553_v11 = vrot.slane %v551_v10, 1  ;;  %v556_v13 = vadd.f32 %v551_v10, %v538_v3 }
 0x3df   :  { %v557_v12 = vadd.f32 %v553_v11, %v545_v4 }
 0x3e1   :  { %v560_v14 = vrot.slane %v557_v12, 7 }
 0x3e3   :  { %v561_v15 = vsel %vm464_vm2, %v560_v14, %v556_v13 }
 0x3e4   :  { %563 = vrot.lane.b32.xlu1 %v561_v15, %s3034_s1 }
 0x456   :  { %v564_v16 = vpop.permute.xlu1 %563 }
 0x457   :  { %v566_v17 = vrot.slane %v564_v16, 1  ;;  %v569_v19 = vadd.f32 %v564_v16, %v556_v13 }
 0x459   :  { %v570_v18 = vadd.f32 %v566_v17, %v557_v12 }
 0x45b   :  { %v573_v20 = vrot.slane %v570_v18, 7 }
 0x45d   :  { %v574_v21 = vsel %vm464_vm2, %v573_v20, %v569_v19 }
 0x45e   :  { %576 = vrot.lane.b32.xlu0 %v574_v21, %s3035_s8 }
 0x4d0   :  { %v577_v22 = vpop.permute.xlu0 %576 }
 0x4d1   :  { %v579_v23 = vrot.slane %v577_v22, 1  ;;  %v582_v26 = vadd.f32 %v577_v22, %v569_v19 }
 0x4d3   :  { %v583_v25 = vadd.f32 %v579_v23, %v570_v18 }
 0x4d5   :  { %v586_v27 = vrot.slane %v583_v25, 7 }
 0x4d7   :  { %v587_v29 = vsel %vm464_vm2, %v586_v27, %v582_v26  ;;  %v2878_v27 = vld [vmem:[#allocation6 + $0xd8] sm:$0xff]  }
 0x4d8   :  { %589 = vrot.lane.b32.xlu1 %v587_v29, %s3031_s0  ;;  %v2880_v29 = vld [vmem:[#allocation6 + $0xe8] sm:$0xff]  }
 0x54a   :  { %v590_v37 = vpop.permute.xlu1 %589 }
 0x54b   :  { %v592_v38 = vrot.slane %v590_v37, 1  ;;  %v595_v40 = vadd.f32 %v590_v37, %v582_v26  ;;  %v2877_v26 = vld [vmem:[#allocation6 + $0xd0] sm:$0xff]  }
 0x54c   :  { %v2885_v37 = vld [vmem:[#allocation6 + $0x150] sm:$0xff]  }
 0x54d   :  { %v596_v41 = vadd.f32 %v592_v38, %v583_v25  ;;  %v597_v42 = vmul.f32 0.00390625, %v595_v40  ;;  %v2886_v38 = vld [vmem:[#allocation6 + $0x158] sm:$0xff]   ;;  %v2887_v40 = vld [vmem:[#allocation6 + $0x160] sm:$0xff]  }
 0x54f   :  { %v598_v43 = vmul.f32 0.00390625, %v596_v41  ;;  %v599_v44 = vadd.f32 1e-05, %v597_v42  ;;  %v2888_v41 = vld [vmem:[#allocation6 + $0x168] sm:$0xff]   ;;  %v2889_v42 = vld [vmem:[#allocation6 + $0x170] sm:$0xff]  }
 0x551   :  { %v600_v45 = vadd.f32 1e-05, %v598_v43  ;;  %2939 = vrsqrt.f32 %v599_v44  ;;  %v2890_v43 = vld [vmem:[#allocation6 + $0x178] sm:$0xff]  }
 0x553   :  { %2941 = vrsqrt.f32 %v600_v45 }
 0x55b   :  { %v2940_v46 = vpop.eup %2939 }
 0x55c   :  { %v606_v51 = vrot.slane %v2940_v46, %v3115_v39 }
 0x55d   :  { %v2942_v52 = vpop.eup %2941 }
 0x55e   :  { %v610_v53 = vrot.slane %v2942_v52, %v3115_v39  ;;  %v611_v54 = vmul.f32 %v606_v51, %v3119_v47  ;;  %v612_v55 = vmul.f32 %v606_v51, %v3121_v48 }
 0x560   :  { %v613_v56 = vmul.f32 %v610_v53, %v3123_v49  ;;  %v614_v57 = vmul.f32 %v610_v53, %v3125_v50  ;;  %v615_v58 = vmax.f32 %v611_v54, 0.0  ;;  %v616_v59 = vmax.f32 %v612_v55, 0.0 }
 0x562   :  { %v617_v60 = vmax.f32 %v613_v56, 0.0  ;;  %v618_v61 = vmax.f32 %v614_v57, 0.0  ;;  %619 = vst [vmem:[#allocation2 + $0x1] sm:$0xff] %v615_v58  ;;  %620 = vst [vmem:[#allocation2 + $0x9] sm:$0xff] %v616_v59 }
 0x564   :  { %621 = vst [vmem:[#allocation2 + $0x19] sm:$0xff] %v617_v60  ;;  %622 = vst [vmem:[#allocation2 + $0x21] sm:$0xff] %v618_v61 }
 0x569   :  { %v623_v62 = vld [vmem:[#allocation2] sm:$0xff]  ;;  %v624_v63 = vld [vmem:[#allocation2 + $0x8] sm:$0xff]  ;;  %v625_v0 = vld [vmem:[#allocation2 + $0x10] sm:$0x3] }
 0x56a   :  { %v629_v1 = vpack.c.bf16 %v624_v63, %v623_v62  ;;  %v630_v2 = vpack.c.bf16 %v625_v0, %v625_v0 }
 0x56b   :  { %v626_v47 = vld [vmem:[#allocation2 + $0x18] sm:$0xff]  ;;  %v627_v3 = vld [vmem:[#allocation2 + $0x20] sm:$0xff]  ;;  %v628_v48 = vld [vmem:[#allocation2 + $0x28] sm:$0x3] }
 0x56c   :  { %v653_v4 = vshll.u32 %v629_v1, 16  ;;  %v658_v49 = vshll.u32 %v630_v2, 16  ;;  %v631_v9 = vpack.c.bf16 %v627_v3, %v626_v47  ;;  %v632_v50 = vpack.c.bf16 %v628_v48, %v628_v48 }
 0x56d   :  { %v651_v10 = vshrl.u32 %v629_v1, 16  ;;  %v891_v33 = vrot.slane %v629_v1, 1  ;;  %v892_v34 = vrot.slane %v630_v2, 1 }
 0x56e   :  { %v655_v11 = vrot.slane %v653_v4, 1  ;;  %v665_v12 = vshll.u32 %v631_v9, 16  ;;  %v670_v13 = vshll.u32 %v632_v50, 16  ;;  %v894_v14 = vrot.slane %v631_v9, 1 }
 0x56f   :  { %v895_v15 = vrot.slane %v632_v50, 1  ;;  %v660_v17 = vrot.slane %v658_v49, 1  ;;  %v663_v18 = vshrl.u32 %v631_v9, 16 }
 0x570   :  { %v656_v16 = vor.u32 %v655_v11, %v651_v10  ;;  %v667_v19 = vrot.slane %v665_v12, 1  ;;  %v672_v23 = vrot.slane %v670_v13, 1 }
 0x571   :  { %v896_v20 = vsel %vm321_vm1, %v894_v14, %v895_v15 }
 0x572   :  { %v661_v21 = vsel %vm79_vm0, %v656_v16, %v660_v17  ;;  %v668_v22 = vor.u32 %v667_v19, %v663_v18 }
 0x573   :  { %2637 = vmatprep.mubr.bf16.mxu1 %v661_v21 }
 0x574   :  { %v673_v25 = vsel %vm79_vm0, %v668_v22, %v672_v23 }
 0x575   :  { %2638 = vmatmul.mubr.bf16.vlgmr.msra.gmra.mrb[0].mxu1 %v673_v25 }
 0x576   :  { %2642 = vmatpush3.bf16.msra.mxu1 %v2875_v36  ;;  %2657 = vmatprep.mubr.bf16.mxu1 %v629_v1  ;;  %v893_v36 = vsel %vm321_vm1, %v891_v33, %v892_v34 }
 0x577   :  { %2643 = vmatprep.subr.bf16.mxu1 %v2876_v24 }
 0x57a   :  { %2644 = vmatpush3.bf16.msra.mxu1 %v2876_v24 }
 0x57b   :  { %2645 = vmatprep.subr.bf16.mxu1 %v2877_v26 }
 0x57e   :  { %2646 = vmatpush3.bf16.msra.mxu1 %v2877_v26 }
 0x57f   :  { %2647 = vmatprep.subr.bf16.mxu1 %v2878_v27 }
 0x582   :  { %2648 = vmatpush3.bf16.msra.mxu1 %v2878_v27 }
 0x583   :  { %2649 = vmatprep.subr.bf16.mxu1 %v2879_v28 }
 0x586   :  { %2650 = vmatpush3.bf16.msra.mxu1 %v2879_v28 }
 0x587   :  { %2651 = vmatprep.subr.bf16.mxu1 %v2880_v29 }
 0x58a   :  { %2652 = vmatpush3.bf16.msra.mxu1 %v2880_v29 }
 0x58b   :  { %2653 = vmatprep.subr.bf16.mxu1 %v2881_v30 }
 0x58e   :  { %2654 = vmatpush3.bf16.msra.mxu1 %v2881_v30 }
 0x58f   :  { %2655 = vmatprep.subr.bf16.mxu1 %v2882_v31 }
 0x592   :  { %2656 = vmatpush3.bf16.msra.mxu1 %v2882_v31 }
 0x593   :  { %2661 = vmatprep.subr.bf16.mxu1 %v2883_v32 }
 0x595   :  { %2658 = vmatmul.mubr.bf16.vlgmr.msra.gmra.mrb[0].mxu1 %v631_v9 }
 0x596   :  { %2662 = vmatpush3.bf16.msra.mxu1 %v2883_v32  ;;  %2677 = vmatprep.mubr.bf16.mxu1 %v893_v36 }
 0x597   :  { %2663 = vmatprep.subr.bf16.mxu1 %v2884_v35 }
 0x59a   :  { %2664 = vmatpush3.bf16.msra.mxu1 %v2884_v35 }
 0x59b   :  { %2665 = vmatprep.subr.bf16.mxu1 %v2885_v37 }
 0x59e   :  { %2666 = vmatpush3.bf16.msra.mxu1 %v2885_v37 }
 0x59f   :  { %2667 = vmatprep.subr.bf16.mxu1 %v2886_v38 }
 0x5a2   :  { %2668 = vmatpush3.bf16.msra.mxu1 %v2886_v38 }
 0x5a3   :  { %2669 = vmatprep.subr.bf16.mxu1 %v2887_v40 }
 0x5a6   :  { %2670 = vmatpush3.bf16.msra.mxu1 %v2887_v40 }
 0x5a7   :  { %2671 = vmatprep.subr.bf16.mxu1 %v2888_v41 }
 0x5aa   :  { %2672 = vmatpush3.bf16.msra.mxu1 %v2888_v41 }
 0x5ab   :  { %2673 = vmatprep.subr.bf16.mxu1 %v2889_v42 }
 0x5ae   :  { %2674 = vmatpush3.bf16.msra.mxu1 %v2889_v42 }
 0x5af   :  { %2675 = vmatprep.subr.bf16.mxu1 %v2890_v43 }
 0x5b2   :  { %2676 = vmatpush3.bf16.msra.mxu1 %v2890_v43 }
 0x5b5   :  { %2678 = vmatmul.mubr.bf16.vlgmr.msra.gmra.mrb[0].mxu1 %v896_v20 }
 0x688   :  { %v2679_v44 = vpop.f32.mrb[0].mxu1 }
 0x689   :  { %v998_v45 = vpop.f32.mrb[1].mxu1 }
 0x68a   :  { %v2680_v46 = vpop.f32.mrb[2].mxu1 }
 0x68b   :  { %v1024_v51 = vadd.f32 %v2680_v46, %v2679_v44  ;;  %v1001_v52 = vpop.f32.mrb[3].mxu1 }
 0x68c   :  { %v1017_v53 = vadd.f32 %v1001_v52, %v998_v45 }
 0x68d   :  { %v1025_v54 = vrot.slane %v1024_v51, 4 }
 0x68e   :  { %v1018_v55 = vrot.slane %v1017_v53, 4 }
 0x68f   :  { %v1026_v56 = vadd.f32 %v1025_v54, %v1024_v51 }
 0x690   :  { %v1019_v57 = vadd.f32 %v1018_v55, %v1017_v53 }
 0x691   :  { %v1027_v58 = vrot.slane %v1026_v56, 2 }
 0x692   :  { %v1020_v59 = vrot.slane %v1019_v57, 2 }
 0x693   :  { %v1028_v60 = vadd.f32 %v1027_v58, %v1026_v56 }
 0x694   :  { %v1021_v61 = vadd.f32 %v1020_v59, %v1019_v57 }
 0x695   :  { %v1029_v62 = vrot.slane %v1028_v60, 1 }
 0x696   :  { %v1022_v63 = vrot.slane %v1021_v61, 1 }
 0x697   :  { %v1030_v0 = vadd.f32 %v1029_v62, %v1028_v60 }
 0x698   :  { %v1023_v1 = vadd.f32 %v1022_v63, %v1021_v61 }
 0x69a   :  { %v1033_v2 = vsel %vm464_vm2, %v1030_v0, %v1023_v1 }
 0x69b   :  { %1035 = vrot.lane.b32.xlu0 %v1033_v2, %s3029_s20 }
 0x70d   :  { %v1036_v47 = vpop.permute.xlu0 %1035 }
 0x70e   :  { %v1038_v3 = vrot.slane %v1036_v47, 1  ;;  %v1041_v4 = vadd.f32 %v1036_v47, %v1023_v1 }
 0x710   :  { %v1042_v48 = vadd.f32 %v1038_v3, %v1030_v0 }
 0x712   :  { %v1045_v49 = vrot.slane %v1042_v48, 7 }
 0x714   :  { %v1046_v9 = vsel %vm464_vm2, %v1045_v49, %v1041_v4  ;;  %v2891_v49 = vld [vmem:[#allocation6 + $0x1c0] sm:$0xff]  }
 0x715   :  { %1048 = vrot.lane.b32.xlu1 %v1046_v9, %s3034_s1  ;;  %2681 = vmatprep.subr.bf16.mxu0 %v2891_v49 }
 0x716   :  { %2682 = vmatpush3.bf16.msra.mxu0 %v2891_v49  ;;  %v2903_v49 = vld [vmem:[#allocation6 + $0x1a0] sm:$0xff]  }
 0x787   :  { %v1049_v50 = vpop.permute.xlu1 %1048 }
 0x788   :  { %v1051_v10 = vrot.slane %v1049_v50, 1  ;;  %v1054_v12 = vadd.f32 %v1049_v50, %v1041_v4 }
 0x78a   :  { %v1055_v11 = vadd.f32 %v1051_v10, %v1042_v48 }
 0x78c   :  { %v1058_v13 = vrot.slane %v1055_v11, 7 }
 0x78e   :  { %v1059_v14 = vsel %vm464_vm2, %v1058_v13, %v1054_v12  ;;  %v2893_v13 = vld [vmem:[#allocation6 + $0x1d0] sm:$0xff]  }
 0x78f   :  { %1061 = vrot.lane.b32.xlu0 %v1059_v14, %s3035_s8  ;;  %v2894_v14 = vld [vmem:[#allocation6 + $0x1d8] sm:$0xff]  }
 0x801   :  { %v1062_v15 = vpop.permute.xlu0 %1061 }
 0x802   :  { %v1064_v16 = vrot.slane %v1062_v15, 1  ;;  %v1067_v18 = vadd.f32 %v1062_v15, %v1054_v12  ;;  %v2895_v15 = vld [vmem:[#allocation6 + $0x1e0] sm:$0xff]  }
 0x804   :  { %v1068_v17 = vadd.f32 %v1064_v16, %v1055_v11  ;;  %v2892_v11 = vld [vmem:[#allocation6 + $0x1c8] sm:$0xff]  }
 0x805   :  { %2683 = vmatprep.subr.bf16.mxu0 %v2892_v11  ;;  %v2896_v16 = vld [vmem:[#allocation6 + $0x1e8] sm:$0xff]  }
 0x806   :  { %v1071_v19 = vrot.slane %v1068_v17, 7  ;;  %2684 = vmatpush3.bf16.msra.mxu0 %v2892_v11  ;;  %v2907_v11 = vld [vmem:[#allocation6 + $0x200] sm:$0xff]  }
 0x807   :  { %2685 = vmatprep.subr.bf16.mxu0 %v2893_v13 }
 0x808   :  { %v1072_v20 = vsel %vm464_vm2, %v1071_v19, %v1067_v18  ;;  %v2899_v19 = vld [vmem:[#allocation6 + $0x180] sm:$0xff]  }
 0x809   :  { %1074 = vrot.lane.b32.xlu1 %v1072_v20, %s3031_s0 }
 0x80a   :  { %2686 = vmatpush3.bf16.msra.mxu0 %v2893_v13 }
 0x80b   :  { %2687 = vmatprep.subr.bf16.mxu0 %v2894_v14 }
 0x80e   :  { %2688 = vmatpush3.bf16.msra.mxu0 %v2894_v14  ;;  %v2908_v14 = vld [vmem:[#allocation6 + $0x208] sm:$0xff]  }
 0x80f   :  { %2689 = vmatprep.subr.bf16.mxu0 %v2895_v15 }
 0x812   :  { %2690 = vmatpush3.bf16.msra.mxu0 %v2895_v15 }
 0x813   :  { %2691 = vmatprep.subr.bf16.mxu0 %v2896_v16 }
 0x816   :  { %2692 = vmatpush3.bf16.msra.mxu0 %v2896_v16  ;;  %v2909_v16 = vld [vmem:[#allocation6 + $0x210] sm:$0xff]  }
 0x87b   :  { %v1075_v21 = vpop.permute.xlu1 %1074 }
 0x87c   :  { %v1077_v22 = vrot.slane %v1075_v21, 1  ;;  %v1080_v23 = vadd.f32 %v1075_v21, %v1067_v18  ;;  %v2898_v18 = vld [vmem:[#allocation6 + $0x1f8] sm:$0xff]  }
 0x87e   :  { %v1081_v24 = vadd.f32 %v1077_v22, %v1068_v17  ;;  %v1082_v25 = vmul.f32 0.00390625, %v1080_v23  ;;  %v2897_v17 = vld [vmem:[#allocation6 + $0x1f0] sm:$0xff]  }
 0x87f   :  { %2693 = vmatprep.subr.bf16.mxu0 %v2897_v17 }
 0x880   :  { %v1083_v26 = vmul.f32 0.00390625, %v1081_v24  ;;  %v1087_v27 = vrot.slane %v1082_v25, %v3115_v39  ;;  %2694 = vmatpush3.bf16.msra.mxu0 %v2897_v17  ;;  %v2910_v17 = vld [vmem:[#allocation6 + $0x218] sm:$0xff]  }
 0x881   :  { %2695 = vmatprep.subr.bf16.mxu0 %v2898_v18 }
 0x882   :  { %v1091_v28 = vrot.slane %v1083_v26, %v3115_v39  ;;  %v3163_v29 = vsub.f32 %v998_v45, %v1087_v27  ;;  %v3165_v30 = vsub.f32 %v1001_v52, %v1087_v27 }
 0x884   :  { %v3167_v31 = vsub.f32 %v2679_v44, %v1091_v28  ;;  %v3169_v32 = vsub.f32 %v2680_v46, %v1091_v28  ;;  %v1096_v33 = vmul.f32 %v3163_v29, %v3163_v29  ;;  %v1097_v34 = vmul.f32 %v3165_v30, %v3165_v30  ;;  %2696 = vmatpush3.bf16.msra.mxu0 %v2898_v18  ;;  %v2911_v18 = vld [vmem:[#allocation6 + $0x220] sm:$0xff]  }
 0x885   :  { %2701 = vmatprep.subr.bf16.mxu0 %v2899_v19 }
 0x886   :  { %v1098_v35 = vmul.f32 %v3167_v31, %v3167_v31  ;;  %v1099_v36 = vmul.f32 %v3169_v32, %v3169_v32  ;;  %v1100_v37 = vadd.f32 %v1097_v34, %v1096_v33 }
 0x888   :  { %v1101_v38 = vrot.slane %v1100_v37, 4  ;;  %v1107_v40 = vadd.f32 %v1099_v36, %v1098_v35 }
 0x88a   :  { %v1102_v41 = vadd.f32 %v1101_v38, %v1100_v37  ;;  %v1108_v42 = vrot.slane %v1107_v40, 4 }
 0x88c   :  { %v1103_v43 = vrot.slane %v1102_v41, 2  ;;  %v1109_v44 = vadd.f32 %v1108_v42, %v1107_v40 }
 0x88e   :  { %v1104_v45 = vadd.f32 %v1103_v43, %v1102_v41  ;;  %v1110_v46 = vrot.slane %v1109_v44, 2 }
 0x890   :  { %v1105_v51 = vrot.slane %v1104_v45, 1  ;;  %v1111_v52 = vadd.f32 %v1110_v46, %v1109_v44 }
 0x892   :  { %v1112_v53 = vrot.slane %v1111_v52, 1  ;;  %v1106_v54 = vadd.f32 %v1105_v51, %v1104_v45 }
 0x894   :  { %v1113_v55 = vadd.f32 %v1112_v53, %v1111_v52 }
 0x896   :  { %v1116_v56 = vsel %vm464_vm2, %v1113_v55, %v1106_v54 }
 0x897   :  { %1118 = vrot.lane.b32.xlu0 %v1116_v56, %s3029_s20 }
 0x909   :  { %v1119_v57 = vpop.permute.xlu0 %1118 }
 0x90a   :  { %v1121_v58 = vrot.slane %v1119_v57, 1  ;;  %v1124_v60 = vadd.f32 %v1119_v57, %v1106_v54 }
 0x90c   :  { %v1125_v59 = vadd.f32 %v1121_v58, %v1113_v55 }
 0x90e   :  { %v1128_v61 = vrot.slane %v1125_v59, 7 }
 0x910   :  { %v1129_v62 = vsel %vm464_vm2, %v1128_v61, %v1124_v60 }
 0x911   :  { %1131 = vrot.lane.b32.xlu1 %v1129_v62, %s3034_s1 }
 0x983   :  { %v1132_v63 = vpop.permute.xlu1 %1131 }
 0x984   :  { %v1134_v0 = vrot.slane %v1132_v63, 1  ;;  %v1137_v2 = vadd.f32 %v1132_v63, %v1124_v60 }
 0x986   :  { %v1138_v1 = vadd.f32 %v1134_v0, %v1125_v59 }
 0x988   :  { %v1141_v47 = vrot.slane %v1138_v1, 7 }
 0x98a   :  { %v1142_v3 = vsel %vm464_vm2, %v1141_v47, %v1137_v2  ;;  %v2900_v47 = vld [vmem:[#allocation6 + $0x188] sm:$0xff]  }
 0x98b   :  { %1144 = vrot.lane.b32.xlu0 %v1142_v3, %s3035_s8 }
 0x9fd   :  { %v1145_v48 = vpop.permute.xlu0 %1144 }
 0x9fe   :  { %v1147_v4 = vrot.slane %v1145_v48, 1  ;;  %v1150_v50 = vadd.f32 %v1145_v48, %v1137_v2  ;;  %v2901_v48 = vld [vmem:[#allocation6 + $0x190] sm:$0xff]  }
 0xa00   :  { %v1151_v9 = vadd.f32 %v1147_v4, %v1138_v1  ;;  %v2902_v4 = vld [vmem:[#allocation6 + $0x198] sm:$0xff]  }
 0xa02   :  { %v1154_v10 = vrot.slane %v1151_v9, 7 }
 0xa04   :  { %v1155_v12 = vsel %vm464_vm2, %v1154_v10, %v1150_v50  ;;  %v2906_v10 = vld [vmem:[#allocation6 + $0x1b8] sm:$0xff]  }
 0xa05   :  { %1157 = vrot.lane.b32.xlu1 %v1155_v12, %s3031_s0 }
 0xa77   :  { %v1158_v20 = vpop.permute.xlu1 %1157 }
 0xa78   :  { %v1160_v21 = vrot.slane %v1158_v20, 1  ;;  %v1163_v22 = vadd.f32 %v1158_v20, %v1150_v50  ;;  %v2905_v50 = vld [vmem:[#allocation6 + $0x1b0] sm:$0xff]  }
 0xa79   :  { %v2913_v20 = vld [vmem:[#allocation6 + $0x230] sm:$0xff]  }
 0xa7a   :  { %v1164_v23 = vadd.f32 %v1160_v21, %v1151_v9  ;;  %v1165_v24 = vmul.f32 0.00390625, %v1163_v22  ;;  %v2904_v9 = vld [vmem:[#allocation6 + $0x1a8] sm:$0xff]   ;;  %v2914_v21 = vld [vmem:[#allocation6 + $0x238] sm:$0xff]  }
 0xa7c   :  { %v1166_v25 = vmul.f32 0.00390625, %v1164_v23  ;;  %v1167_v26 = vadd.f32 1e-05, %v1165_v24 }
 0xa7e   :  { %v1168_v27 = vadd.f32 1e-05, %v1166_v25  ;;  %2943 = vrsqrt.f32 %v1167_v26 }
 0xa80   :  { %2945 = vrsqrt.f32 %v1168_v27 }
 0xa88   :  { %v2944_v28 = vpop.eup %2943 }
 0xa89   :  { %v1174_v33 = vrot.slane %v2944_v28, %v3115_v39 }
 0xa8a   :  { %v2946_v34 = vpop.eup %2945 }
 0xa8b   :  { %v1178_v35 = vrot.slane %v2946_v34, %v3115_v39  ;;  %v1179_v36 = vmul.f32 %v1174_v33, %v3163_v29  ;;  %v1180_v37 = vmul.f32 %v1174_v33, %v3165_v30 }
 0xa8d   :  { %v1181_v38 = vmul.f32 %v1178_v35, %v3167_v31  ;;  %v1182_v40 = vmul.f32 %v1178_v35, %v3169_v32  ;;  %v3194_v41 = vadd.f32 %v1179_v36, %v3081_v5  ;;  %v3197_v42 = vadd.f32 %v1180_v37, %v3083_v6 }
 0xa8f   :  { %v3200_v43 = vadd.f32 %v1181_v38, %v3087_v7  ;;  %v3203_v44 = vadd.f32 %v1182_v40, %v3089_v8  ;;  %1187 = vst [vmem:[#allocation2 + $0x1] sm:$0xff] %v3194_v41  ;;  %1188 = vst [vmem:[#allocation2 + $0x9] sm:$0xff] %v3197_v42 }
 0xa91   :  { %1189 = vst [vmem:[#allocation2 + $0x19] sm:$0xff] %v3200_v43  ;;  %1190 = vst [vmem:[#allocation2 + $0x21] sm:$0xff] %v3203_v44 }
 0xa96   :  { %v1191_v29 = vld [vmem:[#allocation2] sm:$0xff]  ;;  %v1192_v5 = vld [vmem:[#allocation2 + $0x8] sm:$0xff]  ;;  %v1193_v30 = vld [vmem:[#allocation2 + $0x10] sm:$0x3] }
 0xa97   :  { %v1197_v31 = vpack.c.bf16 %v1192_v5, %v1191_v29  ;;  %v1198_v6 = vpack.c.bf16 %v1193_v30, %v1193_v30 }
 0xa98   :  { %v1194_v32 = vld [vmem:[#allocation2 + $0x18] sm:$0xff]  ;;  %v1195_v45 = vld [vmem:[#allocation2 + $0x20] sm:$0xff]  ;;  %v1196_v7 = vld [vmem:[#allocation2 + $0x28] sm:$0x3] }
 0xa99   :  { %v1221_v46 = vshll.u32 %v1197_v31, 16  ;;  %v1226_v51 = vshll.u32 %v1198_v6, 16  ;;  %v1199_v8 = vpack.c.bf16 %v1195_v45, %v1194_v32  ;;  %v1200_v52 = vpack.c.bf16 %v1196_v7, %v1196_v7 }
 0xa9a   :  { %v1219_v53 = vshrl.u32 %v1197_v31, 16  ;;  %v1459_v12 = vrot.slane %v1197_v31, 1  ;;  %v1460_v13 = vrot.slane %v1198_v6, 1 }
 0xa9b   :  { %v1223_v54 = vrot.slane %v1221_v46, 1  ;;  %v1233_v55 = vshll.u32 %v1199_v8, 16  ;;  %v1238_v56 = vshll.u32 %v1200_v52, 16  ;;  %v1462_v57 = vrot.slane %v1199_v8, 1 }
 0xa9c   :  { %v1463_v58 = vrot.slane %v1200_v52, 1  ;;  %v1228_v60 = vrot.slane %v1226_v51, 1  ;;  %v1231_v61 = vshrl.u32 %v1199_v8, 16  ;;  %v1461_v15 = vsel %vm321_vm1, %v1459_v12, %v1460_v13 }
 0xa9d   :  { %v1224_v59 = vor.u32 %v1223_v54, %v1219_v53  ;;  %v1235_v62 = vrot.slane %v1233_v55, 1  ;;  %v1240_v2 = vrot.slane %v1238_v56, 1 }
 0xa9e   :  { %v1464_v63 = vsel %vm321_vm1, %v1462_v57, %v1463_v58 }
 0xa9f   :  { %v1229_v0 = vsel %vm79_vm0, %v1224_v59, %v1228_v60  ;;  %v1236_v1 = vor.u32 %v1235_v62, %v1231_v61 }
 0xaa0   :  { %2697 = vmatprep.mubr.bf16.mxu0 %v1229_v0 }
 0xaa1   :  { %v1241_v3 = vsel %vm79_vm0, %v1236_v1, %v1240_v2 }
 0xaa2   :  { %2698 = vmatmul.mubr.bf16.vlgmr.msra.gmra.mrb[4].mxu0 %v1241_v3 }
 0xaa3   :  { %2702 = vmatpush3.bf16.msra.mxu0 %v2899_v19  ;;  %2717 = vmatprep.mubr.bf16.mxu0 %v1197_v31  ;;  %v2912_v19 = vld [vmem:[#allocation6 + $0x228] sm:$0xff]  }
 0xaa4   :  { %2703 = vmatprep.subr.bf16.mxu0 %v2900_v47 }
 0xaa7   :  { %2704 = vmatpush3.bf16.msra.mxu0 %v2900_v47 }
 0xaa8   :  { %2705 = vmatprep.subr.bf16.mxu0 %v2901_v48 }
 0xaab   :  { %2706 = vmatpush3.bf16.msra.mxu0 %v2901_v48 }
 0xaac   :  { %2707 = vmatprep.subr.bf16.mxu0 %v2902_v4 }
 0xaaf   :  { %2708 = vmatpush3.bf16.msra.mxu0 %v2902_v4 }
 0xab0   :  { %2709 = vmatprep.subr.bf16.mxu0 %v2903_v49 }
 0xab3   :  { %2710 = vmatpush3.bf16.msra.mxu0 %v2903_v49 }
 0xab4   :  { %2711 = vmatprep.subr.bf16.mxu0 %v2904_v9 }
 0xab7   :  { %2712 = vmatpush3.bf16.msra.mxu0 %v2904_v9 }
 0xab8   :  { %2713 = vmatprep.subr.bf16.mxu0 %v2905_v50 }
 0xabb   :  { %2714 = vmatpush3.bf16.msra.mxu0 %v2905_v50 }
 0xabc   :  { %2715 = vmatprep.subr.bf16.mxu0 %v2906_v10 }
 0xabf   :  { %2716 = vmatpush3.bf16.msra.mxu0 %v2906_v10 }
 0xac0   :  { %2721 = vmatprep.subr.bf16.mxu0 %v2907_v11 }
 0xac2   :  { %2718 = vmatmul.mubr.bf16.vlgmr.msra.gmra.mrb[4].mxu0 %v1199_v8 }
 0xac3   :  { %2722 = vmatpush3.bf16.msra.mxu0 %v2907_v11  ;;  %2737 = vmatprep.mubr.bf16.mxu0 %v1461_v15 }
 0xac4   :  { %2723 = vmatprep.subr.bf16.mxu0 %v2908_v14 }
 0xac7   :  { %2724 = vmatpush3.bf16.msra.mxu0 %v2908_v14 }
 0xac8   :  { %2725 = vmatprep.subr.bf16.mxu0 %v2909_v16 }
 0xacb   :  { %2726 = vmatpush3.bf16.msra.mxu0 %v2909_v16 }
 0xacc   :  { %2727 = vmatprep.subr.bf16.mxu0 %v2910_v17 }
 0xacf   :  { %2728 = vmatpush3.bf16.msra.mxu0 %v2910_v17 }
 0xad0   :  { %2729 = vmatprep.subr.bf16.mxu0 %v2911_v18 }
 0xad3   :  { %2730 = vmatpush3.bf16.msra.mxu0 %v2911_v18 }
 0xad4   :  { %2731 = vmatprep.subr.bf16.mxu0 %v2912_v19 }
 0xad7   :  { %2732 = vmatpush3.bf16.msra.mxu0 %v2912_v19 }
 0xad8   :  { %2733 = vmatprep.subr.bf16.mxu0 %v2913_v20 }
 0xadb   :  { %2734 = vmatpush3.bf16.msra.mxu0 %v2913_v20 }
 0xadc   :  { %2735 = vmatprep.subr.bf16.mxu0 %v2914_v21 }
 0xadf   :  { %2736 = vmatpush3.bf16.msra.mxu0 %v2914_v21 }
 0xae2   :  { %2738 = vmatmul.mubr.bf16.vlgmr.msra.gmra.mrb[4].mxu0 %v1464_v63 }
 0xbb5   :  { %v2739_v22 = vpop.f32.mrb[4].mxu0 }
 0xbb6   :  { %v1566_v23 = vpop.f32.mrb[5].mxu0 }
 0xbb7   :  { %v2740_v24 = vpop.f32.mrb[6].mxu0 }
 0xbb8   :  { %v1592_v25 = vadd.f32 %v2740_v24, %v2739_v22  ;;  %v1569_v26 = vpop.f32.mrb[7].mxu0 }
 0xbb9   :  { %v1585_v27 = vadd.f32 %v1569_v26, %v1566_v23 }
 0xbba   :  { %v1593_v28 = vrot.slane %v1592_v25, 4 }
 0xbbb   :  { %v1586_v33 = vrot.slane %v1585_v27, 4 }
 0xbbc   :  { %v1594_v34 = vadd.f32 %v1593_v28, %v1592_v25 }
 0xbbd   :  { %v1587_v35 = vadd.f32 %v1586_v33, %v1585_v27 }
 0xbbe   :  { %v1595_v36 = vrot.slane %v1594_v34, 2 }
 0xbbf   :  { %v1588_v37 = vrot.slane %v1587_v35, 2 }
 0xbc0   :  { %v1596_v38 = vadd.f32 %v1595_v36, %v1594_v34 }
 0xbc1   :  { %v1589_v40 = vadd.f32 %v1588_v37, %v1587_v35 }
 0xbc2   :  { %v1597_v29 = vrot.slane %v1596_v38, 1 }
 0xbc3   :  { %v1590_v5 = vrot.slane %v1589_v40, 1 }
 0xbc4   :  { %v1598_v30 = vadd.f32 %v1597_v29, %v1596_v38 }
 0xbc5   :  { %v1591_v31 = vadd.f32 %v1590_v5, %v1589_v40 }
 0xbc7   :  { %v1601_v6 = vsel %vm464_vm2, %v1598_v30, %v1591_v31 }
 0xbc8   :  { %1603 = vrot.lane.b32.xlu0 %v1601_v6, %s3029_s20 }
 0xc3a   :  { %v1604_v32 = vpop.permute.xlu0 %1603 }
 0xc3b   :  { %v1606_v45 = vrot.slane %v1604_v32, 1  ;;  %v1609_v46 = vadd.f32 %v1604_v32, %v1591_v31 }
 0xc3d   :  { %v1610_v7 = vadd.f32 %v1606_v45, %v1598_v30 }
 0xc3f   :  { %v1613_v51 = vrot.slane %v1610_v7, 7 }
 0xc41   :  { %v1614_v8 = vsel %vm464_vm2, %v1613_v51, %v1609_v46  ;;  %v2915_v51 = vld [vmem:[#allocation6 + $0x280] sm:$0xff]  }
 0xc42   :  { %1616 = vrot.lane.b32.xlu1 %v1614_v8, %s3034_s1  ;;  %2741 = vmatprep.subr.bf16.mxu1 %v2915_v51 }
 0xc43   :  { %2742 = vmatpush3.bf16.msra.mxu1 %v2915_v51  ;;  %v2924_v51 = vld [vmem:[#allocation6 + $0x248] sm:$0xff]  }
 0xcb4   :  { %v1617_v52 = vpop.permute.xlu1 %1616 }
 0xcb5   :  { %v1619_v53 = vrot.slane %v1617_v52, 1  ;;  %v1622_v55 = vadd.f32 %v1617_v52, %v1609_v46 }
 0xcb7   :  { %v1623_v54 = vadd.f32 %v1619_v53, %v1610_v7 }
 0xcb9   :  { %v1626_v56 = vrot.slane %v1623_v54, 7 }
 0xcbb   :  { %v1627_v57 = vsel %vm464_vm2, %v1626_v56, %v1622_v55  ;;  %v2917_v56 = vld [vmem:[#allocation6 + $0x290] sm:$0xff]  }
 0xcbc   :  { %1629 = vrot.lane.b32.xlu0 %v1627_v57, %s3035_s8  ;;  %v2918_v57 = vld [vmem:[#allocation6 + $0x298] sm:$0xff]  }
 0xd2e   :  { %v1630_v58 = vpop.permute.xlu0 %1629 }
 0xd2f   :  { %v1632_v59 = vrot.slane %v1630_v58, 1  ;;  %v1635_v61 = vadd.f32 %v1630_v58, %v1622_v55  ;;  %v2919_v58 = vld [vmem:[#allocation6 + $0x2a0] sm:$0xff]  }
 0xd31   :  { %v1636_v60 = vadd.f32 %v1632_v59, %v1623_v54  ;;  %v2916_v54 = vld [vmem:[#allocation6 + $0x288] sm:$0xff]  }
 0xd32   :  { %2743 = vmatprep.subr.bf16.mxu1 %v2916_v54  ;;  %v2920_v59 = vld [vmem:[#allocation6 + $0x2a8] sm:$0xff]  }
 0xd33   :  { %v1639_v62 = vrot.slane %v1636_v60, 7  ;;  %2744 = vmatpush3.bf16.msra.mxu1 %v2916_v54  ;;  %v2927_v54 = vld [vmem:[#allocation6 + $0x260] sm:$0xff]  }
 0xd34   :  { %2745 = vmatprep.subr.bf16.mxu1 %v2917_v56 }
 0xd35   :  { %v1640_v63 = vsel %vm464_vm2, %v1639_v62, %v1635_v61  ;;  %v2923_v62 = vld [vmem:[#allocation6 + $0x240] sm:$0xff]  }
 0xd36   :  { %1642 = vrot.lane.b32.xlu1 %v1640_v63, %s3031_s0 }
 0xd37   :  { %2746 = vmatpush3.bf16.msra.mxu1 %v2917_v56  ;;  %v2929_v56 = vld [vmem:[#allocation6 + $0x270] sm:$0xff]  }
 0xd38   :  { %2747 = vmatprep.subr.bf16.mxu1 %v2918_v57 }
 0xd3b   :  { %2748 = vmatpush3.bf16.msra.mxu1 %v2918_v57  ;;  %v2930_v57 = vld [vmem:[#allocation6 + $0x278] sm:$0xff]  }
 0xd3c   :  { %2749 = vmatprep.subr.bf16.mxu1 %v2919_v58 }
 0xd3f   :  { %2750 = vmatpush3.bf16.msra.mxu1 %v2919_v58  ;;  %v2931_v58 = vld [vmem:[#allocation6 + $0x2c0] sm:$0xff]  }
 0xd40   :  { %2751 = vmatprep.subr.bf16.mxu1 %v2920_v59 }
 0xd43   :  { %2752 = vmatpush3.bf16.msra.mxu1 %v2920_v59 }
 0xda8   :  { %v1643_v0 = vpop.permute.xlu1 %1642 }
 0xda9   :  { %v1645_v1 = vrot.slane %v1643_v0, 1  ;;  %v1648_v2 = vadd.f32 %v1643_v0, %v1635_v61  ;;  %v2922_v61 = vld [vmem:[#allocation6 + $0x2b8] sm:$0xff]  }
 0xdab   :  { %v1649_v47 = vadd.f32 %v1645_v1, %v1636_v60  ;;  %v1650_v3 = vmul.f32 0.00390625, %v1648_v2  ;;  %v2921_v60 = vld [vmem:[#allocation6 + $0x2b0] sm:$0xff]  }
 0xdac   :  { %2753 = vmatprep.subr.bf16.mxu1 %v2921_v60 }
 0xdad   :  { %v1651_v48 = vmul.f32 0.00390625, %v1649_v47  ;;  %v1655_v4 = vrot.slane %v1650_v3, %v3115_v39  ;;  %2754 = vmatpush3.bf16.msra.mxu1 %v2921_v60 }
 0xdae   :  { %2755 = vmatprep.subr.bf16.mxu1 %v2922_v61 }
 0xdaf   :  { %v1659_v49 = vrot.slane %v1651_v48, %v3115_v39  ;;  %v3223_v9 = vsub.f32 %v1566_v23, %v1655_v4  ;;  %v3225_v50 = vsub.f32 %v1569_v26, %v1655_v4 }
 0xdb1   :  { %v3227_v10 = vsub.f32 %v2739_v22, %v1659_v49  ;;  %v3229_v11 = vsub.f32 %v2740_v24, %v1659_v49  ;;  %v1664_v12 = vmul.f32 %v3223_v9, %v3223_v9  ;;  %v1665_v13 = vmul.f32 %v3225_v50, %v3225_v50  ;;  %2756 = vmatpush3.bf16.msra.mxu1 %v2922_v61  ;;  %v2932_v61 = vld [vmem:[#allocation6 + $0x2c8] sm:$0xff]  }
 0xdb2   :  { %2761 = vmatprep.subr.bf16.mxu1 %v2923_v62 }
 0xdb3   :  { %v1666_v14 = vmul.f32 %v3227_v10, %v3227_v10  ;;  %v1667_v15 = vmul.f32 %v3229_v11, %v3229_v11  ;;  %v1668_v16 = vadd.f32 %v1665_v13, %v1664_v12 }
 0xdb5   :  { %v1669_v17 = vrot.slane %v1668_v16, 4  ;;  %v1675_v18 = vadd.f32 %v1667_v15, %v1666_v14 }
 0xdb7   :  { %v1670_v19 = vadd.f32 %v1669_v17, %v1668_v16  ;;  %v1676_v20 = vrot.slane %v1675_v18, 4 }
 0xdb9   :  { %v1671_v21 = vrot.slane %v1670_v19, 2  ;;  %v1677_v22 = vadd.f32 %v1676_v20, %v1675_v18 }
 0xdbb   :  { %v1672_v23 = vadd.f32 %v1671_v21, %v1670_v19  ;;  %v1678_v24 = vrot.slane %v1677_v22, 2 }
 0xdbd   :  { %v1673_v25 = vrot.slane %v1672_v23, 1  ;;  %v1679_v26 = vadd.f32 %v1678_v24, %v1677_v22 }
 0xdbf   :  { %v1680_v27 = vrot.slane %v1679_v26, 1  ;;  %v1674_v28 = vadd.f32 %v1673_v25, %v1672_v23 }
 0xdc1   :  { %v1681_v33 = vadd.f32 %v1680_v27, %v1679_v26 }
 0xdc3   :  { %v1684_v34 = vsel %vm464_vm2, %v1681_v33, %v1674_v28 }
 0xdc4   :  { %1686 = vrot.lane.b32.xlu0 %v1684_v34, %s3029_s20 }
 0xe36   :  { %v1687_v35 = vpop.permute.xlu0 %1686 }
 0xe37   :  { %v1689_v36 = vrot.slane %v1687_v35, 1  ;;  %v1692_v38 = vadd.f32 %v1687_v35, %v1674_v28 }
 0xe39   :  { %v1693_v37 = vadd.f32 %v1689_v36, %v1681_v33 }
 0xe3b   :  { %v1696_v40 = vrot.slane %v1693_v37, 7 }
 0xe3d   :  { %v1697_v29 = vsel %vm464_vm2, %v1696_v40, %v1692_v38 }
 0xe3e   :  { %1699 = vrot.lane.b32.xlu1 %v1697_v29, %s3034_s1 }
 0xeb0   :  { %v1700_v5 = vpop.permute.xlu1 %1699 }
 0xeb1   :  { %v1702_v30 = vrot.slane %v1700_v5, 1  ;;  %v1705_v6 = vadd.f32 %v1700_v5, %v1692_v38 }
 0xeb3   :  { %v1706_v31 = vadd.f32 %v1702_v30, %v1693_v37 }
 0xeb5   :  { %v1709_v32 = vrot.slane %v1706_v31, 7 }
 0xeb7   :  { %v1710_v45 = vsel %vm464_vm2, %v1709_v32, %v1705_v6 }
 0xeb8   :  { %1712 = vrot.lane.b32.xlu0 %v1710_v45, %s3035_s8 }
 0xf2a   :  { %v1713_v7 = vpop.permute.xlu0 %1712 }
 0xf2b   :  { %v1715_v46 = vrot.slane %v1713_v7, 1  ;;  %v1718_v52 = vadd.f32 %v1713_v7, %v1705_v6 }
 0xf2d   :  { %v1719_v8 = vadd.f32 %v1715_v46, %v1706_v31 }
 0xf2f   :  { %v1722_v53 = vrot.slane %v1719_v8, 7 }
 0xf31   :  { %v1723_v55 = vsel %vm464_vm2, %v1722_v53, %v1718_v52  ;;  %v2926_v53 = vld [vmem:[#allocation6 + $0x258] sm:$0xff]  }
 0xf32   :  { %1725 = vrot.lane.b32.xlu1 %v1723_v55, %s3031_s0  ;;  %v2928_v55 = vld [vmem:[#allocation6 + $0x268] sm:$0xff]  }
 0xfa4   :  { %v1726_v63 = vpop.permute.xlu1 %1725 }
 0xfa5   :  { %v1728_v0 = vrot.slane %v1726_v63, 1  ;;  %v1731_v1 = vadd.f32 %v1726_v63, %v1718_v52  ;;  %v2925_v52 = vld [vmem:[#allocation6 + $0x250] sm:$0xff]  }
 0xfa6   :  { %v2933_v63 = vld [vmem:[#allocation6 + $0x2d0] sm:$0xff]  }
 0xfa7   :  { %v1732_v2 = vadd.f32 %v1728_v0, %v1719_v8  ;;  %v1733_v47 = vmul.f32 0.00390625, %v1731_v1  ;;  %v2934_v0 = vld [vmem:[#allocation6 + $0x2d8] sm:$0xff]   ;;  %v2935_v1 = vld [vmem:[#allocation6 + $0x2e0] sm:$0xff]  }
 0xfa9   :  { %v1734_v3 = vmul.f32 0.00390625, %v1732_v2  ;;  %v1735_v48 = vadd.f32 1e-05, %v1733_v47  ;;  %v2936_v2 = vld [vmem:[#allocation6 + $0x2e8] sm:$0xff]   ;;  %v2937_v47 = vld [vmem:[#allocation6 + $0x2f0] sm:$0xff]  }
 0xfab   :  { %v1736_v4 = vadd.f32 1e-05, %v1734_v3  ;;  %2947 = vrsqrt.f32 %v1735_v48  ;;  %v2938_v3 = vld [vmem:[#allocation6 + $0x2f8] sm:$0xff]  }
 0xfad   :  { %2949 = vrsqrt.f32 %v1736_v4 }
 0xfb5   :  { %v2948_v49 = vpop.eup %2947 }
 0xfb6   :  { %v1742_v12 = vrot.slane %v2948_v49, %v3115_v39 }
 0xfb7   :  { %v2950_v13 = vpop.eup %2949 }
 0xfb8   :  { %v1746_v14 = vrot.slane %v2950_v13, %v3115_v39  ;;  %v1747_v15 = vmul.f32 %v1742_v12, %v3223_v9  ;;  %v1748_v16 = vmul.f32 %v1742_v12, %v3225_v50 }
 0xfba   :  { %v1749_v17 = vmul.f32 %v1746_v14, %v3227_v10  ;;  %v1750_v18 = vmul.f32 %v1746_v14, %v3229_v11  ;;  %v1751_v19 = vmax.f32 %v1747_v15, 0.0  ;;  %v1752_v20 = vmax.f32 %v1748_v16, 0.0 }
 0xfbc   :  { %v1753_v21 = vmax.f32 %v1749_v17, 0.0  ;;  %v1754_v22 = vmax.f32 %v1750_v18, 0.0  ;;  %1755 = vst [vmem:[#allocation2 + $0x1] sm:$0xff] %v1751_v19  ;;  %1756 = vst [vmem:[#allocation2 + $0x9] sm:$0xff] %v1752_v20 }
 0xfbe   :  { %1757 = vst [vmem:[#allocation2 + $0x19] sm:$0xff] %v1753_v21  ;;  %1758 = vst [vmem:[#allocation2 + $0x21] sm:$0xff] %v1754_v22 }
 0xfc3   :  { %v1759_v23 = vld [vmem:[#allocation2] sm:$0xff]  ;;  %v1760_v24 = vld [vmem:[#allocation2 + $0x8] sm:$0xff]  ;;  %v1761_v25 = vld [vmem:[#allocation2 + $0x10] sm:$0x3] }
 0xfc4   :  { %v1765_v26 = vpack.c.bf16 %v1760_v24, %v1759_v23  ;;  %v1766_v27 = vpack.c.bf16 %v1761_v25, %v1761_v25 }
 0xfc5   :  { %v1762_v9 = vld [vmem:[#allocation2 + $0x18] sm:$0xff]  ;;  %v1763_v28 = vld [vmem:[#allocation2 + $0x20] sm:$0xff]  ;;  %v1764_v50 = vld [vmem:[#allocation2 + $0x28] sm:$0x3] }
 0xfc6   :  { %v1789_v33 = vshll.u32 %v1765_v26, 16  ;;  %v1794_v10 = vshll.u32 %v1766_v27, 16  ;;  %v1767_v34 = vpack.c.bf16 %v1763_v28, %v1762_v9  ;;  %v1768_v11 = vpack.c.bf16 %v1764_v50, %v1764_v50 }
 0xfc7   :  { %v1787_v35 = vshrl.u32 %v1765_v26, 16  ;;  %v2027_v59 = vrot.slane %v1765_v26, 1  ;;  %v2028_v60 = vrot.slane %v1766_v27, 1 }
 0xfc8   :  { %v1791_v36 = vrot.slane %v1789_v33, 1  ;;  %v1801_v37 = vshll.u32 %v1767_v34, 16  ;;  %v1806_v38 = vshll.u32 %v1768_v11, 16  ;;  %v2030_v40 = vrot.slane %v1767_v34, 1 }
 0xfc9   :  { %v2031_v29 = vrot.slane %v1768_v11, 1  ;;  %v1796_v30 = vrot.slane %v1794_v10, 1  ;;  %v1799_v31 = vshrl.u32 %v1767_v34, 16 }
 0xfca   :  { %v1792_v5 = vor.u32 %v1791_v36, %v1787_v35  ;;  %v1803_v6 = vrot.slane %v1801_v37, 1  ;;  %v1808_v46 = vrot.slane %v1806_v38, 1 }
 0xfcb   :  { %v2032_v32 = vsel %vm321_vm1, %v2030_v40, %v2031_v29 }
 0xfcc   :  { %v1797_v45 = vsel %vm79_vm0, %v1792_v5, %v1796_v30  ;;  %v1804_v7 = vor.u32 %v1803_v6, %v1799_v31 }
 0xfcd   :  { %2757 = vmatprep.mubr.bf16.mxu1 %v1797_v45 }
 0xfce   :  { %v1809_v8 = vsel %vm79_vm0, %v1804_v7, %v1808_v46 }
 0xfcf   :  { %2758 = vmatmul.mubr.bf16.vlgmr.msra.gmra.mrb[4].mxu1 %v1809_v8 }
 0xfd0   :  { %2762 = vmatpush3.bf16.msra.mxu1 %v2923_v62  ;;  %2777 = vmatprep.mubr.bf16.mxu1 %v1765_v26  ;;  %v2029_v62 = vsel %vm321_vm1, %v2027_v59, %v2028_v60 }
 0xfd1   :  { %2763 = vmatprep.subr.bf16.mxu1 %v2924_v51 }
 0xfd4   :  { %2764 = vmatpush3.bf16.msra.mxu1 %v2924_v51 }
 0xfd5   :  { %2765 = vmatprep.subr.bf16.mxu1 %v2925_v52 }
 0xfd8   :  { %2766 = vmatpush3.bf16.msra.mxu1 %v2925_v52 }
 0xfd9   :  { %2767 = vmatprep.subr.bf16.mxu1 %v2926_v53 }
 0xfdc   :  { %2768 = vmatpush3.bf16.msra.mxu1 %v2926_v53 }
 0xfdd   :  { %2769 = vmatprep.subr.bf16.mxu1 %v2927_v54 }
 0xfe0   :  { %2770 = vmatpush3.bf16.msra.mxu1 %v2927_v54 }
 0xfe1   :  { %2771 = vmatprep.subr.bf16.mxu1 %v2928_v55 }
 0xfe4   :  { %2772 = vmatpush3.bf16.msra.mxu1 %v2928_v55 }
 0xfe5   :  { %2773 = vmatprep.subr.bf16.mxu1 %v2929_v56 }
 0xfe8   :  { %2774 = vmatpush3.bf16.msra.mxu1 %v2929_v56 }
 0xfe9   :  { %2775 = vmatprep.subr.bf16.mxu1 %v2930_v57 }
 0xfec   :  { %2776 = vmatpush3.bf16.msra.mxu1 %v2930_v57 }
 0xfed   :  { %2781 = vmatprep.subr.bf16.mxu1 %v2931_v58 }
 0xfef   :  { %2778 = vmatmul.mubr.bf16.vlgmr.msra.gmra.mrb[4].mxu1 %v1767_v34 }
 0xff0   :  { %2782 = vmatpush3.bf16.msra.mxu1 %v2931_v58  ;;  %2797 = vmatprep.mubr.bf16.mxu1 %v2029_v62 }
 0xff1   :  { %2783 = vmatprep.subr.bf16.mxu1 %v2932_v61 }
 0xff4   :  { %2784 = vmatpush3.bf16.msra.mxu1 %v2932_v61 }
 0xff5   :  { %2785 = vmatprep.subr.bf16.mxu1 %v2933_v63 }
 0xff8   :  { %2786 = vmatpush3.bf16.msra.mxu1 %v2933_v63 }
 0xff9   :  { %2787 = vmatprep.subr.bf16.mxu1 %v2934_v0 }
 0xffc   :  { %2788 = vmatpush3.bf16.msra.mxu1 %v2934_v0 }
 0xffd   :  { %2789 = vmatprep.subr.bf16.mxu1 %v2935_v1 }
0x1000   :  { %2790 = vmatpush3.bf16.msra.mxu1 %v2935_v1 }
0x1001   :  { %2791 = vmatprep.subr.bf16.mxu1 %v2936_v2 }
0x1004   :  { %2792 = vmatpush3.bf16.msra.mxu1 %v2936_v2 }
0x1005   :  { %2793 = vmatprep.subr.bf16.mxu1 %v2937_v47 }
0x1008   :  { %2794 = vmatpush3.bf16.msra.mxu1 %v2937_v47 }
0x1009   :  { %2795 = vmatprep.subr.bf16.mxu1 %v2938_v3 }
0x100c   :  { %2796 = vmatpush3.bf16.msra.mxu1 %v2938_v3 }
0x100f   :  { %2798 = vmatmul.mubr.bf16.vlgmr.msra.gmra.mrb[4].mxu1 %v2032_v32 }
0x10e2   :  { %v2799_v48 = vpop.f32.mrb[4].mxu1 }
0x10e3   :  { %v2134_v4 = vpop.f32.mrb[5].mxu1 }
0x10e4   :  { %v2800_v49 = vpop.f32.mrb[6].mxu1 }
0x10e5   :  { %v2160_v12 = vadd.f32 %v2800_v49, %v2799_v48  ;;  %v2137_v13 = vpop.f32.mrb[7].mxu1 }
0x10e6   :  { %v2153_v14 = vadd.f32 %v2137_v13, %v2134_v4 }
0x10e7   :  { %v2161_v15 = vrot.slane %v2160_v12, 4 }
0x10e8   :  { %v2154_v16 = vrot.slane %v2153_v14, 4 }
0x10e9   :  { %v2162_v17 = vadd.f32 %v2161_v15, %v2160_v12 }
0x10ea   :  { %v2155_v18 = vadd.f32 %v2154_v16, %v2153_v14 }
0x10eb   :  { %v2163_v19 = vrot.slane %v2162_v17, 2 }
0x10ec   :  { %v2156_v20 = vrot.slane %v2155_v18, 2 }
0x10ed   :  { %v2164_v21 = vadd.f32 %v2163_v19, %v2162_v17 }
0x10ee   :  { %v2157_v22 = vadd.f32 %v2156_v20, %v2155_v18 }
0x10ef   :  { %v2165_v23 = vrot.slane %v2164_v21, 1 }
0x10f0   :  { %v2158_v24 = vrot.slane %v2157_v22, 1 }
0x10f1   :  { %v2166_v25 = vadd.f32 %v2165_v23, %v2164_v21 }
0x10f2   :  { %v2159_v26 = vadd.f32 %v2158_v24, %v2157_v22 }
0x10f4   :  { %v2169_v27 = vsel %vm464_vm2, %v2166_v25, %v2159_v26 }
0x10f5   :  { %2171 = vrot.lane.b32.xlu0 %v2169_v27, %s3029_s20 }
0x1167   :  { %v2172_v9 = vpop.permute.xlu0 %2171 }
0x1168   :  { %v2174_v28 = vrot.slane %v2172_v9, 1  ;;  %v2177_v33 = vadd.f32 %v2172_v9, %v2159_v26 }
0x116a   :  { %v2178_v50 = vadd.f32 %v2174_v28, %v2166_v25 }
0x116c   :  { %v2181_v10 = vrot.slane %v2178_v50, 7 }
0x116e   :  { %v2182_v34 = vsel %vm464_vm2, %v2181_v10, %v2177_v33 }
0x116f   :  { %2184 = vrot.lane.b32.xlu1 %v2182_v34, %s3034_s1 }
0x11e1   :  { %v2185_v11 = vpop.permute.xlu1 %2184 }
0x11e2   :  { %v2187_v35 = vrot.slane %v2185_v11, 1  ;;  %v2190_v37 = vadd.f32 %v2185_v11, %v2177_v33 }
0x11e4   :  { %v2191_v36 = vadd.f32 %v2187_v35, %v2178_v50 }
0x11e6   :  { %v2194_v38 = vrot.slane %v2191_v36, 7 }
0x11e8   :  { %v2195_v40 = vsel %vm464_vm2, %v2194_v38, %v2190_v37 }
0x11e9   :  { %2197 = vrot.lane.b32.xlu0 %v2195_v40, %s3035_s8 }
0x125b   :  { %v2198_v29 = vpop.permute.xlu0 %2197 }
0x125c   :  { %v2200_v5 = vrot.slane %v2198_v29, 1  ;;  %v2203_v31 = vadd.f32 %v2198_v29, %v2190_v37 }
0x125e   :  { %v2204_v30 = vadd.f32 %v2200_v5, %v2191_v36 }
0x1260   :  { %v2207_v6 = vrot.slane %v2204_v30, 7 }
0x1262   :  { %v2208_v32 = vsel %vm464_vm2, %v2207_v6, %v2203_v31 }
0x1263   :  { %2210 = vrot.lane.b32.xlu1 %v2208_v32, %s3031_s0 }
0x12d5   :  { %v2211_v45 = vpop.permute.xlu1 %2210 }
0x12d6   :  { %v2213_v7 = vrot.slane %v2211_v45, 1  ;;  %v2216_v46 = vadd.f32 %v2211_v45, %v2203_v31 }
0x12d8   :  { %v2217_v51 = vadd.f32 %v2213_v7, %v2204_v30  ;;  %v2218_v8 = vmul.f32 0.00390625, %v2216_v46 }
0x12da   :  { %v2219_v52 = vmul.f32 0.00390625, %v2217_v51  ;;  %v2223_v53 = vrot.slane %v2218_v8, %v3115_v39 }
0x12dc   :  { %v2227_v54 = vrot.slane %v2219_v52, %v3115_v39  ;;  %v2228_v55 = vsub.f32 %v2134_v4, %v2223_v53  ;;  %v2229_v56 = vsub.f32 %v2137_v13, %v2223_v53 }
0x12de   :  { %v2230_v57 = vsub.f32 %v2799_v48, %v2227_v54  ;;  %v2231_v58 = vsub.f32 %v2800_v49, %v2227_v54  ;;  %v2232_v59 = vmul.f32 %v2228_v55, %v2228_v55  ;;  %v2233_v60 = vmul.f32 %v2229_v56, %v2229_v56 }
0x12e0   :  { %v2234_v61 = vmul.f32 %v2230_v57, %v2230_v57  ;;  %v2235_v62 = vmul.f32 %v2231_v58, %v2231_v58  ;;  %v2236_v63 = vadd.f32 %v2233_v60, %v2232_v59 }
0x12e2   :  { %v2237_v0 = vrot.slane %v2236_v63, 4  ;;  %v2243_v1 = vadd.f32 %v2235_v62, %v2234_v61 }
0x12e4   :  { %v2238_v2 = vadd.f32 %v2237_v0, %v2236_v63  ;;  %v2244_v47 = vrot.slane %v2243_v1, 4 }
0x12e6   :  { %v2239_v3 = vrot.slane %v2238_v2, 2  ;;  %v2245_v12 = vadd.f32 %v2244_v47, %v2243_v1 }
0x12e8   :  { %v2240_v14 = vadd.f32 %v2239_v3, %v2238_v2  ;;  %v2246_v15 = vrot.slane %v2245_v12, 2 }
0x12ea   :  { %v2241_v16 = vrot.slane %v2240_v14, 1  ;;  %v2247_v17 = vadd.f32 %v2246_v15, %v2245_v12 }
0x12ec   :  { %v2248_v18 = vrot.slane %v2247_v17, 1  ;;  %v2242_v4 = vadd.f32 %v2241_v16, %v2240_v14 }
0x12ee   :  { %v2249_v13 = vadd.f32 %v2248_v18, %v2247_v17 }
0x12f0   :  { %v2252_v48 = vsel %vm464_vm2, %v2249_v13, %v2242_v4 }
0x12f1   :  { %2254 = vrot.lane.b32.xlu0 %v2252_v48, %s3029_s20 }
0x1363   :  { %v2255_v49 = vpop.permute.xlu0 %2254 }
0x1364   :  { %v2257_v19 = vrot.slane %v2255_v49, 1  ;;  %v2260_v21 = vadd.f32 %v2255_v49, %v2242_v4 }
0x1366   :  { %v2261_v20 = vadd.f32 %v2257_v19, %v2249_v13 }
0x1368   :  { %v2264_v22 = vrot.slane %v2261_v20, 7 }
0x136a   :  { %v2265_v23 = vsel %vm464_vm2, %v2264_v22, %v2260_v21 }
0x136b   :  { %2267 = vrot.lane.b32.xlu1 %v2265_v23, %s3034_s1 }
0x13dd   :  { %v2268_v24 = vpop.permute.xlu1 %2267 }
0x13de   :  { %v2270_v25 = vrot.slane %v2268_v24, 1  ;;  %v2273_v27 = vadd.f32 %v2268_v24, %v2260_v21 }
0x13e0   :  { %v2274_v26 = vadd.f32 %v2270_v25, %v2261_v20 }
0x13e2   :  { %v2277_v9 = vrot.slane %v2274_v26, 7 }
0x13e4   :  { %v2278_v28 = vsel %vm464_vm2, %v2277_v9, %v2273_v27 }
0x13e5   :  { %2280 = vrot.lane.b32.xlu0 %v2278_v28, %s3035_s8 }
0x1457   :  { %v2281_v50 = vpop.permute.xlu0 %2280 }
0x1458   :  { %v2283_v33 = vrot.slane %v2281_v50, 1  ;;  %v2286_v34 = vadd.f32 %v2281_v50, %v2273_v27 }
0x145a   :  { %v2287_v10 = vadd.f32 %v2283_v33, %v2274_v26 }
0x145c   :  { %v2290_v11 = vrot.slane %v2287_v10, 7 }
0x145e   :  { %v2291_v35 = vsel %vm464_vm2, %v2290_v11, %v2286_v34 }
0x145f   :  { %2293 = vrot.lane.b32.xlu1 %v2291_v35, %s3031_s0 }
0x14d1   :  { %v2294_v36 = vpop.permute.xlu1 %2293 }
0x14d2   :  { %v2296_v37 = vrot.slane %v2294_v36, 1  ;;  %v2299_v38 = vadd.f32 %v2294_v36, %v2286_v34 }
0x14d4   :  { %v2300_v40 = vadd.f32 %v2296_v37, %v2287_v10  ;;  %v2301_v29 = vmul.f32 0.00390625, %v2299_v38 }
0x14d6   :  { %v2302_v5 = vmul.f32 0.00390625, %v2300_v40  ;;  %v2303_v30 = vadd.f32 1e-05, %v2301_v29 }
0x14d8   :  { %v2304_v31 = vadd.f32 1e-05, %v2302_v5  ;;  %2951 = vrsqrt.f32 %v2303_v30 }
0x14da   :  { %2953 = vrsqrt.f32 %v2304_v31 }
0x14e2   :  { %v2952_v6 = vpop.eup %2951 }
0x14e3   :  { %v2310_v32 = vrot.slane %v2952_v6, %v3115_v39 }
0x14e4   :  { %v2954_v45 = vpop.eup %2953 }
0x14e5   :  { %v2314_v7 = vrot.slane %v2954_v45, %v3115_v39  ;;  %v2315_v46 = vmul.f32 %v2310_v32, %v2228_v55  ;;  %v2316_v51 = vmul.f32 %v2310_v32, %v2229_v56 }
0x14e7   :  { %v2317_v8 = vmul.f32 %v2314_v7, %v2230_v57  ;;  %v2318_v52 = vmul.f32 %v2314_v7, %v2231_v58  ;;  %v2319_v53 = vadd.f32 %v2315_v46, %v3194_v41  ;;  %v2320_v54 = vadd.f32 %v2316_v51, %v3197_v42 }
0x14e9   :  { %v2321_v59 = vadd.f32 %v2317_v8, %v3200_v43  ;;  %v2322_v60 = vadd.f32 %v2318_v52, %v3203_v44  ;;  %2323 = vst [vmem:[#allocation8] sm:$0xff] %v2319_v53  ;;  %2324 = vst [vmem:[#allocation8 + $0x8] sm:$0xff] %v2320_v54 }
0x14eb   :  { %2325 = vst [vmem:[#allocation8 + $0x10] sm:$0xff] %v2321_v59  ;;  %2326 = vst [vmem:[#allocation8 + $0x18] sm:$0xff] %v2322_v60 }
0x14ec   :  { %3010 = shalt.err (!%p3007_p6)
}
0x14ed   :  { %s3011_s14 = scalar_lea.hbm %s3298_s2, 512 }
0x14ee   :  { %p3012_p7 = scmp.ne.s32.totalorder %s3298_s2, %s3011_s14  ;;  %p3015_p8 = scmp.lt.u32.totalorder %s3011_s14, %s3298_s2 }
0x14f0   :  { %p3017_p9 = pnand %p3015_p8, %p3012_p7 }
0x14f2   :  { %3020 = shalt.err (!%p3017_p9)
}
0x14f3   :  { %2338 = dma.vmem_to_hbm [thread:$0]  %s2333_s10, 512, %s3298_s2, [#allocation5], %s3028_s19, %s3028_s19, %s3029_s20  }
0x14f4   :  { %3025 = dma.done.wait [#allocation5], 512  }
0x14f5   :  { %3026 = vsyncadd [#allocation5], 4294966784 }
0x14f6   :  { %2342 = vsyncpa [#allocation4], 1 }
0x14f7   :  { %2343 = vsyncpa [#allocation7], 1 }
0x14f8   :  { %2344 = vsyncpa [#allocation5], 1 }

</bundles_post_ra>
